<compile_context>
chip_gen: v7x
topology: tpu7x:2x2x1
jax: 0.10.0
libtpu: 0.0.40
codegen_flags: <defaults>
</compile_context>

<pallas_src>
import functools

import numpy as np

import jax
import jax.numpy as jnp
from jax.experimental import pallas as pl
from jax.experimental.pallas import tpu as pltpu


def _rup8(n):
    return (n + 7) // 8 * 8


# ---------------------------------------------------------------------------
# Fused Pallas kernel: conv1+relu+pool1+conv2+relu+pool2+fc1+fc2+fc3
# ---------------------------------------------------------------------------
def _cnn_kernel(lhs1_ref, rhs1_ref, b1_ref, selk_ref, bw2_ref, b2_ref,
                selp_ref, wf1_ref, bf1_ref, wf2_ref, bf2_ref, wf3_ref, bf3_ref,
                out_ref, *, G1, G2):
    f32 = jnp.float32

    # ---- conv1 (single banded matmul) + bias + ReLU ------------------------
    # rows: di*G1 + (b*14 + i2)       lanes: dj*128 + j2*8 + oc
    y1 = jnp.dot(lhs1_ref[...], rhs1_ref[...], preferred_element_type=f32)
    y1 = jnp.maximum(y1 + b1_ref[...], 0.0)                     # (2*G1, 256)

    # ---- pool1: max over di (row halves) then dj (128-lane halves) ---------
    a1 = jnp.maximum(y1[0:G1, :], y1[G1:2 * G1, :])             # (G1, 256)
    a1 = jnp.maximum(a1[:, 0:128], a1[:, 128:256])              # (G1, 128)
    # a1 rows: b*14 + i2              lanes: j2*8 + ic

    # ---- conv2: 5 x (row-shift selection @ banded weights) -----------------
    acc2 = None
    for ki in range(5):
        shifted = jnp.dot(selk_ref[ki], a1,
                          preferred_element_type=f32)           # (2*G2, 128)
        term = jnp.dot(shifted, bw2_ref[ki],
                       preferred_element_type=f32)              # (2*G2, 256)
        acc2 = term if acc2 is None else acc2 + term
    y2 = jnp.maximum(acc2 + b2_ref[...], 0.0)
    # y2 rows: di*G2 + (b*5 + pi)     lanes: dj*128 + pj*16 + oc2

    # ---- pool2 --------------------------------------------------------------
    a2 = jnp.maximum(y2[0:G2, :], y2[G2:2 * G2, :])             # (G2, 256)
    a2 = jnp.maximum(a2[:, 0:128], a2[:, 128:256])              # (G2, 128)
    # a2 rows: b*5 + pi               lanes: pj*16 + oc2

    # ---- fc1: 5-term row-pair selection; flatten folded into packed weights
    h = None
    for pi in range(5):
        rows = jnp.dot(selp_ref[pi], a2, preferred_element_type=f32)   # (R, 128)
        term = jnp.dot(rows, wf1_ref[pi], preferred_element_type=f32)  # (R, 128)
        h = term if h is None else h + term
    h = jnp.maximum(h + bf1_ref[...], 0.0)

    # ---- fc2 / fc3 ----------------------------------------------------------
    h = jnp.maximum(jnp.dot(h, wf2_ref[...], preferred_element_type=f32)
                    + bf2_ref[...], 0.0)
    out_ref[...] = (jnp.dot(h, wf3_ref[...], preferred_element_type=f32)
                    + bf3_ref[...])


# ---------------------------------------------------------------------------
# Host-side (one-time) parameter packing into MXU-friendly banded matrices
# ---------------------------------------------------------------------------
def pack_params(p, batch):
    f32 = jnp.float32
    B = batch
    G1 = _rup8(B * 14)          # pool1 row-group size
    G2 = _rup8(B * 5)           # pool2 row-group size
    R = _rup8(B)                # FC row count

    # conv1 -> banded RHS (480, 256)
    #   K index  : (ic*5 + ki)*32 + w    (w = absolute input column)
    #   lane idx : dj*128 + j2*8 + oc    (output column j = 2*j2 + dj)
    oc_g, ic_g, ki_g, kj_g, j_g = np.meshgrid(
        np.arange(6), np.arange(3), np.arange(5), np.arange(5), np.arange(28),
        indexing="ij")
    w_g = j_g + kj_g
    krow = (ic_g * 5 + ki_g) * 32 + w_g
    lcol = (j_g % 2) * 128 + (j_g // 2) * 8 + oc_g
    w1 = p["conv1_w"].astype(f32)
    rhs1 = jnp.zeros((480, 256), f32).at[krow.ravel(), lcol.ravel()].set(
        w1[oc_g.ravel(), ic_g.ravel(), ki_g.ravel(), kj_g.ravel()])

    lane = np.arange(256)
    oc_of, j2_of = lane % 8, (lane % 128) // 8
    m1 = (oc_of < 6) & (j2_of < 14)
    b1 = jnp.zeros((256,), f32).at[lane[m1]].set(
        p["conv1_b"].astype(f32)[oc_of[m1]]).reshape(1, 256)

    # conv2 row-shift selectors (0/1 constants): (5, 2*G2, G1)
    ki_s, di_s, b_s, pi_s = np.meshgrid(
        np.arange(5), np.arange(2), np.arange(B), np.arange(5), indexing="ij")
    selk = np.zeros((5, 2 * G2, G1), np.float32)
    selk[ki_s.ravel(),
         (di_s * G2 + b_s * 5 + pi_s).ravel(),
         (b_s * 14 + 2 * pi_s + di_s + ki_s).ravel()] = 1.0

    # conv2 -> 5 banded RHS blocks (5, 128, 256)
    #   row idx  : j2*8 + ic
    #   lane idx : dj*128 + pj*16 + oc2   (output column oj = 2*pj + dj)
    ki_b, oc2_b, ic_b, kj_b, pj_b, dj_b = np.meshgrid(
        np.arange(5), np.arange(16), np.arange(6), np.arange(5), np.arange(5),
        np.arange(2), indexing="ij")
    j2_b = 2 * pj_b + dj_b + kj_b
    w2 = p["conv2_w"].astype(f32)
    bw2 = jnp.zeros((5, 128, 256), f32).at[
        ki_b.ravel(), (j2_b * 8 + ic_b).ravel(),
        (dj_b * 128 + pj_b * 16 + oc2_b).ravel()].set(
        w2[oc2_b.ravel(), ic_b.ravel(), ki_b.ravel(), kj_b.ravel()])

    oc2_of, pj_of = lane % 16, (lane % 128) // 16
    m2 = pj_of < 5
    b2 = jnp.zeros((256,), f32).at[lane[m2]].set(
        p["conv2_b"].astype(f32)[oc2_of[m2]]).reshape(1, 256)

    # fc1 row-pair selectors (5, R, G2) + per-row-position weights (5, 128, 128)
    selp = np.zeros((5, R, G2), np.float32)
    for pi in range(5):
        for b in range(B):
            selp[pi, b, b * 5 + pi] = 1.0

    pi_f, pj_f, oc2_f, n_f = np.meshgrid(
        np.arange(5), np.arange(5), np.arange(16), np.arange(120),
        indexing="ij")
    fw1 = p["fc1_w"].astype(f32)
    wf1 = jnp.zeros((5, 128, 128), f32).at[
        pi_f.ravel(), (pj_f * 16 + oc2_f).ravel(), n_f.ravel()].set(
        fw1[n_f.ravel(), (oc2_f * 25 + pi_f * 5 + pj_f).ravel()])
    bf1 = jnp.zeros((128,), f32).at[:120].set(
        p["fc1_b"].astype(f32)).reshape(1, 128)

    wf2 = jnp.zeros((128, 128), f32).at[:120, :84].set(p["fc2_w"].astype(f32).T)
    bf2 = jnp.zeros((128,), f32).at[:84].set(
        p["fc2_b"].astype(f32)).reshape(1, 128)
    wf3 = jnp.zeros((128, 128), f32).at[:84, :10].set(p["fc3_w"].astype(f32).T)
    bf3 = jnp.zeros((128,), f32).at[:10].set(
        p["fc3_b"].astype(f32)).reshape(1, 128)

    return {
        "rhs1": rhs1, "b1": b1, "selk": jnp.asarray(selk), "bw2": bw2,
        "b2": b2, "selp": jnp.asarray(selp), "wf1": wf1, "bf1": bf1,
        "wf2": wf2, "bf2": bf2, "wf3": wf3, "bf3": bf3,
    }


def _pack_input(x):
    """(B,3,32,32) NCHW -> conv1 LHS (2*G1, 480).

    row = di*G1 + b*14 + i2   (conv1 output row i = 2*i2 + di)
    col = (ic*5 + ki)*32 + w  (absolute input column w)
    """
    B = x.shape[0]
    G1 = _rup8(B * 14)
    groups = []
    for di in range(2):
        per_ki = [x[:, :, di + ki:di + ki + 27:2, :] for ki in range(5)]
        stk = jnp.stack(per_ki, axis=2)            # (B, 3, 5, 14, 32)
        stk = stk.transpose(0, 3, 1, 2, 4)         # (B, 14, 3, 5, 32)
        stk = stk.reshape(B * 14, 3 * 5 * 32)      # rows b*14 + i2
        pad = jnp.zeros((G1 - B * 14, 480), x.dtype)
        groups.append(jnp.concatenate([stk, pad], axis=0))
    return jnp.concatenate(groups, axis=0)         # (2*G1, 480)


def cnn_forward(x, packed):
    B = x.shape[0]
    G1 = _rup8(B * 14)
    G2 = _rup8(B * 5)
    R = _rup8(B)
    lhs1 = _pack_input(x)
    kernel = functools.partial(_cnn_kernel, G1=G1, G2=G2)
    out = pl.pallas_call(
        kernel,
        out_shape=jax.ShapeDtypeStruct((R, 128), jnp.float32),
        in_specs=[pl.BlockSpec(memory_space=pltpu.MemorySpace.VMEM)] * 13,
        out_specs=pl.BlockSpec(memory_space=pltpu.MemorySpace.VMEM),
    )(lhs1, packed["rhs1"], packed["b1"], packed["selk"], packed["bw2"],
      packed["b2"], packed["selp"], packed["wf1"], packed["bf1"],
      packed["wf2"], packed["bf2"], packed["wf3"], packed["bf3"])
    return out[:B, :10]


# ---------------------------------------------------------------------------
# Deterministic parameter init (PyTorch-style uniform bounds)
# ---------------------------------------------------------------------------
def init_params(key):
    ks = jax.random.split(key, 10)

    def u(k, shape, fan_in):
        bound = 1.0 / (fan_in ** 0.5)
        return jax.random.uniform(k, shape, jnp.float32, -bound, bound)

    return {
        "conv1_w": u(ks[0], (6, 3, 5, 5), 3 * 5 * 5),
        "conv1_b": u(ks[1], (6,), 3 * 5 * 5),
        "conv2_w": u(ks[2], (16, 6, 5, 5), 6 * 5 * 5),
        "conv2_b": u(ks[3], (16,), 6 * 5 * 5),
        "fc1_w": u(ks[4], (120, 400), 400),
        "fc1_b": u(ks[5], (120,), 400),
        "fc2_w": u(ks[6], (84, 120), 120),
        "fc2_b": u(ks[7], (84,), 120),
        "fc3_w": u(ks[8], (10, 84), 84),
        "fc3_b": u(ks[9], (10,), 84),
    }


# ---------------------------------------------------------------------------
# Pure-JAX reference for correctness check
# ---------------------------------------------------------------------------
def ref_forward(x, p):
    def conv(x, w, b):
        y = jax.lax.conv_general_dilated(
            x, w, (1, 1), "VALID", dimension_numbers=("NCHW", "OIHW", "NCHW"))
        return y + b[None, :, None, None]

    def pool(x):
        B, C, H, W = x.shape
        return jnp.max(x.reshape(B, C, H // 2, 2, W // 2, 2), axis=(3, 5))

    y = pool(jnp.maximum(conv(x, p["conv1_w"], p["conv1_b"]), 0.0))
    y = pool(jnp.maximum(conv(y, p["conv2_w"], p["conv2_b"]), 0.0))
    y = y.reshape(y.shape[0], -1)
    y = jnp.maximum(y @ p["fc1_w"].T + p["fc1_b"], 0.0)
    y = jnp.maximum(y @ p["fc2_w"].T + p["fc2_b"], 0.0)
    return y @ p["fc3_w"].T + p["fc3_b"]


if __name__ == "__main__":
    key = jax.random.PRNGKey(0)
    k_x, k_p = jax.random.split(key)
    # CIFAR-style input: 32x32 is required so the flatten gives 16*5*5 = 400.
    x = jax.random.normal(k_x, (2, 3, 32, 32), dtype=jnp.float32)
    params = init_params(k_p)

    packed = pack_params(params, batch=x.shape[0])   # one-time weight packing
    fwd = jax.jit(cnn_forward)
    out = jax.block_until_ready(fwd(x, packed))
    assert out.shape == (2, 10), out.shape

    ref = ref_forward(x, params)
    err = float(jnp.max(jnp.abs(out - ref)))
    assert jnp.allclose(out, ref, rtol=1e-3, atol=1e-3), err

    print("KERNEL_OK")
</pallas_src>

<mosaic_0001>
module attributes {stable_mosaic.version = 11 : i64} {
  func.func @_cnn_kernel(%arg0: memref<64x480xf32, #tpu.memory_space<vmem>>, %arg1: memref<480x256xf32, #tpu.memory_space<vmem>>, %arg2: memref<1x256xf32, #tpu.memory_space<vmem>>, %arg3: memref<5x32x32xf32, #tpu.memory_space<vmem>>, %arg4: memref<5x128x256xf32, #tpu.memory_space<vmem>>, %arg5: memref<1x256xf32, #tpu.memory_space<vmem>>, %arg6: memref<5x8x16xf32, #tpu.memory_space<vmem>>, %arg7: memref<5x128x128xf32, #tpu.memory_space<vmem>>, %arg8: memref<1x128xf32, #tpu.memory_space<vmem>>, %arg9: memref<128x128xf32, #tpu.memory_space<vmem>>, %arg10: memref<1x128xf32, #tpu.memory_space<vmem>>, %arg11: memref<128x128xf32, #tpu.memory_space<vmem>>, %arg12: memref<1x128xf32, #tpu.memory_space<vmem>>, %arg13: memref<8x128xf32, #tpu.memory_space<vmem>>) attributes {dimension_semantics = [], scalar_prefetch = 0 : i64, scratch_operands = 0 : i64, tpu.core_type = #tpu.core_type<tc>} {
    %c0 = arith.constant 0 : index
    %c0_0 = arith.constant 0 : index
    %0 = vector.load %arg0[%c0, %c0_0] : memref<64x480xf32, #tpu.memory_space<vmem>>, vector<64x480xf32>
    %c0_1 = arith.constant 0 : index
    %c0_2 = arith.constant 0 : index
    %1 = vector.load %arg1[%c0_1, %c0_2] : memref<480x256xf32, #tpu.memory_space<vmem>>, vector<480x256xf32>
    %cst = arith.constant dense<0.000000e+00> : vector<64x256xf32>
    %2 = tpu.matmul %0, %1, %cst {dimension_numbers = #tpu.dot_dimension_numbers<[1], [0], [0], [1], [0, 0, 1, 1], [], []>} : vector<64x480xf32>, vector<480x256xf32>, vector<64x256xf32> -> vector<64x256xf32>
    %c0_3 = arith.constant 0 : index
    %c0_4 = arith.constant 0 : index
    %3 = vector.load %arg2[%c0_3, %c0_4] : memref<1x256xf32, #tpu.memory_space<vmem>>, vector<1x256xf32>
    %4 = vector.broadcast %3 : vector<1x256xf32> to vector<64x256xf32>
    %5 = arith.addf %2, %4 : vector<64x256xf32>
    %cst_5 = arith.constant 0.000000e+00 : f32
    %6 = vector.broadcast %cst_5 : f32 to vector<64x256xf32>
    %7 = arith.maximumf %5, %6 : vector<64x256xf32>
    %8 = vector.extract_strided_slice %7 {offsets = [0, 0], sizes = [32, 256], strides = [1, 1]} : vector<64x256xf32> to vector<32x256xf32>
    %9 = vector.extract_strided_slice %7 {offsets = [32, 0], sizes = [32, 256], strides = [1, 1]} : vector<64x256xf32> to vector<32x256xf32>
    %10 = arith.maximumf %8, %9 : vector<32x256xf32>
    %11 = vector.extract_strided_slice %10 {offsets = [0, 0], sizes = [32, 128], strides = [1, 1]} : vector<32x256xf32> to vector<32x128xf32>
    %12 = vector.extract_strided_slice %10 {offsets = [0, 128], sizes = [32, 128], strides = [1, 1]} : vector<32x256xf32> to vector<32x128xf32>
    %13 = arith.maximumf %11, %12 : vector<32x128xf32>
    %c0_6 = arith.constant 0 : index
    %c0_7 = arith.constant 0 : index
    %c0_8 = arith.constant 0 : index
    %14 = vector.load %arg3[%c0_6, %c0_7, %c0_8] : memref<5x32x32xf32, #tpu.memory_space<vmem>>, vector<1x32x32xf32>
    %15 = vector.shape_cast %14 : vector<1x32x32xf32> to vector<32x32xf32>
    %cst_9 = arith.constant dense<0.000000e+00> : vector<32x128xf32>
    %16 = tpu.matmul %15, %13, %cst_9 {dimension_numbers = #tpu.dot_dimension_numbers<[1], [0], [0], [1], [0, 0, 1, 1], [], []>} : vector<32x32xf32>, vector<32x128xf32>, vector<32x128xf32> -> vector<32x128xf32>
    %c0_10 = arith.constant 0 : index
    %c0_11 = arith.constant 0 : index
    %c0_12 = arith.constant 0 : index
    %17 = vector.load %arg4[%c0_10, %c0_11, %c0_12] : memref<5x128x256xf32, #tpu.memory_space<vmem>>, vector<1x128x256xf32>
    %18 = vector.shape_cast %17 : vector<1x128x256xf32> to vector<128x256xf32>
    %cst_13 = arith.constant dense<0.000000e+00> : vector<32x256xf32>
    %19 = tpu.matmul %16, %18, %cst_13 {dimension_numbers = #tpu.dot_dimension_numbers<[1], [0], [0], [1], [0, 0, 1, 1], [], []>} : vector<32x128xf32>, vector<128x256xf32>, vector<32x256xf32> -> vector<32x256xf32>
    %c1 = arith.constant 1 : index
    %c0_14 = arith.constant 0 : index
    %c0_15 = arith.constant 0 : index
    %20 = vector.load %arg3[%c1, %c0_14, %c0_15] : memref<5x32x32xf32, #tpu.memory_space<vmem>>, vector<1x32x32xf32>
    %21 = vector.shape_cast %20 : vector<1x32x32xf32> to vector<32x32xf32>
    %cst_16 = arith.constant dense<0.000000e+00> : vector<32x128xf32>
    %22 = tpu.matmul %21, %13, %cst_16 {dimension_numbers = #tpu.dot_dimension_numbers<[1], [0], [0], [1], [0, 0, 1, 1], [], []>} : vector<32x32xf32>, vector<32x128xf32>, vector<32x128xf32> -> vector<32x128xf32>
    %c1_17 = arith.constant 1 : index
    %c0_18 = arith.constant 0 : index
    %c0_19 = arith.constant 0 : index
    %23 = vector.load %arg4[%c1_17, %c0_18, %c0_19] : memref<5x128x256xf32, #tpu.memory_space<vmem>>, vector<1x128x256xf32>
    %24 = vector.shape_cast %23 : vector<1x128x256xf32> to vector<128x256xf32>
    %cst_20 = arith.constant dense<0.000000e+00> : vector<32x256xf32>
    %25 = tpu.matmul %22, %24, %cst_20 {dimension_numbers = #tpu.dot_dimension_numbers<[1], [0], [0], [1], [0, 0, 1, 1], [], []>} : vector<32x128xf32>, vector<128x256xf32>, vector<32x256xf32> -> vector<32x256xf32>
    %26 = arith.addf %19, %25 : vector<32x256xf32>
    %c2 = arith.constant 2 : index
    %c0_21 = arith.constant 0 : index
    %c0_22 = arith.constant 0 : index
    %27 = vector.load %arg3[%c2, %c0_21, %c0_22] : memref<5x32x32xf32, #tpu.memory_space<vmem>>, vector<1x32x32xf32>
    %28 = vector.shape_cast %27 : vector<1x32x32xf32> to vector<32x32xf32>
    %cst_23 = arith.constant dense<0.000000e+00> : vector<32x128xf32>
    %29 = tpu.matmul %28, %13, %cst_23 {dimension_numbers = #tpu.dot_dimension_numbers<[1], [0], [0], [1], [0, 0, 1, 1], [], []>} : vector<32x32xf32>, vector<32x128xf32>, vector<32x128xf32> -> vector<32x128xf32>
    %c2_24 = arith.constant 2 : index
    %c0_25 = arith.constant 0 : index
    %c0_26 = arith.constant 0 : index
    %30 = vector.load %arg4[%c2_24, %c0_25, %c0_26] : memref<5x128x256xf32, #tpu.memory_space<vmem>>, vector<1x128x256xf32>
    %31 = vector.shape_cast %30 : vector<1x128x256xf32> to vector<128x256xf32>
    %cst_27 = arith.constant dense<0.000000e+00> : vector<32x256xf32>
    %32 = tpu.matmul %29, %31, %cst_27 {dimension_numbers = #tpu.dot_dimension_numbers<[1], [0], [0], [1], [0, 0, 1, 1], [], []>} : vector<32x128xf32>, vector<128x256xf32>, vector<32x256xf32> -> vector<32x256xf32>
    %33 = arith.addf %26, %32 : vector<32x256xf32>
    %c3 = arith.constant 3 : index
    %c0_28 = arith.constant 0 : index
    %c0_29 = arith.constant 0 : index
    %34 = vector.load %arg3[%c3, %c0_28, %c0_29] : memref<5x32x32xf32, #tpu.memory_space<vmem>>, vector<1x32x32xf32>
    %35 = vector.shape_cast %34 : vector<1x32x32xf32> to vector<32x32xf32>
    %cst_30 = arith.constant dense<0.000000e+00> : vector<32x128xf32>
    %36 = tpu.matmul %35, %13, %cst_30 {dimension_numbers = #tpu.dot_dimension_numbers<[1], [0], [0], [1], [0, 0, 1, 1], [], []>} : vector<32x32xf32>, vector<32x128xf32>, vector<32x128xf32> -> vector<32x128xf32>
    %c3_31 = arith.constant 3 : index
    %c0_32 = arith.constant 0 : index
    %c0_33 = arith.constant 0 : index
    %37 = vector.load %arg4[%c3_31, %c0_32, %c0_33] : memref<5x128x256xf32, #tpu.memory_space<vmem>>, vector<1x128x256xf32>
    %38 = vector.shape_cast %37 : vector<1x128x256xf32> to vector<128x256xf32>
    %cst_34 = arith.constant dense<0.000000e+00> : vector<32x256xf32>
    %39 = tpu.matmul %36, %38, %cst_34 {dimension_numbers = #tpu.dot_dimension_numbers<[1], [0], [0], [1], [0, 0, 1, 1], [], []>} : vector<32x128xf32>, vector<128x256xf32>, vector<32x256xf32> -> vector<32x256xf32>
    %40 = arith.addf %33, %39 : vector<32x256xf32>
    %c4 = arith.constant 4 : index
    %c0_35 = arith.constant 0 : index
    %c0_36 = arith.constant 0 : index
    %41 = vector.load %arg3[%c4, %c0_35, %c0_36] : memref<5x32x32xf32, #tpu.memory_space<vmem>>, vector<1x32x32xf32>
    %42 = vector.shape_cast %41 : vector<1x32x32xf32> to vector<32x32xf32>
    %cst_37 = arith.constant dense<0.000000e+00> : vector<32x128xf32>
    %43 = tpu.matmul %42, %13, %cst_37 {dimension_numbers = #tpu.dot_dimension_numbers<[1], [0], [0], [1], [0, 0, 1, 1], [], []>} : vector<32x32xf32>, vector<32x128xf32>, vector<32x128xf32> -> vector<32x128xf32>
    %c4_38 = arith.constant 4 : index
    %c0_39 = arith.constant 0 : index
    %c0_40 = arith.constant 0 : index
    %44 = vector.load %arg4[%c4_38, %c0_39, %c0_40] : memref<5x128x256xf32, #tpu.memory_space<vmem>>, vector<1x128x256xf32>
    %45 = vector.shape_cast %44 : vector<1x128x256xf32> to vector<128x256xf32>
    %cst_41 = arith.constant dense<0.000000e+00> : vector<32x256xf32>
    %46 = tpu.matmul %43, %45, %cst_41 {dimension_numbers = #tpu.dot_dimension_numbers<[1], [0], [0], [1], [0, 0, 1, 1], [], []>} : vector<32x128xf32>, vector<128x256xf32>, vector<32x256xf32> -> vector<32x256xf32>
    %47 = arith.addf %40, %46 : vector<32x256xf32>
    %c0_42 = arith.constant 0 : index
    %c0_43 = arith.constant 0 : index
    %48 = vector.load %arg5[%c0_42, %c0_43] : memref<1x256xf32, #tpu.memory_space<vmem>>, vector<1x256xf32>
    %49 = vector.broadcast %48 : vector<1x256xf32> to vector<32x256xf32>
    %50 = arith.addf %47, %49 : vector<32x256xf32>
    %cst_44 = arith.constant 0.000000e+00 : f32
    %51 = vector.broadcast %cst_44 : f32 to vector<32x256xf32>
    %52 = arith.maximumf %50, %51 : vector<32x256xf32>
    %53 = vector.extract_strided_slice %52 {offsets = [0, 0], sizes = [16, 256], strides = [1, 1]} : vector<32x256xf32> to vector<16x256xf32>
    %54 = vector.extract_strided_slice %52 {offsets = [16, 0], sizes = [16, 256], strides = [1, 1]} : vector<32x256xf32> to vector<16x256xf32>
    %55 = arith.maximumf %53, %54 : vector<16x256xf32>
    %56 = vector.extract_strided_slice %55 {offsets = [0, 0], sizes = [16, 128], strides = [1, 1]} : vector<16x256xf32> to vector<16x128xf32>
    %57 = vector.extract_strided_slice %55 {offsets = [0, 128], sizes = [16, 128], strides = [1, 1]} : vector<16x256xf32> to vector<16x128xf32>
    %58 = arith.maximumf %56, %57 : vector<16x128xf32>
    %c0_45 = arith.constant 0 : index
    %c0_46 = arith.constant 0 : index
    %c0_47 = arith.constant 0 : index
    %59 = vector.load %arg6[%c0_45, %c0_46, %c0_47] : memref<5x8x16xf32, #tpu.memory_space<vmem>>, vector<1x8x16xf32>
    %60 = vector.shape_cast %59 : vector<1x8x16xf32> to vector<8x16xf32>
    %cst_48 = arith.constant dense<0.000000e+00> : vector<8x128xf32>
    %61 = tpu.matmul %60, %58, %cst_48 {dimension_numbers = #tpu.dot_dimension_numbers<[1], [0], [0], [1], [0, 0, 1, 1], [], []>} : vector<8x16xf32>, vector<16x128xf32>, vector<8x128xf32> -> vector<8x128xf32>
    %c0_49 = arith.constant 0 : index
    %c0_50 = arith.constant 0 : index
    %c0_51 = arith.constant 0 : index
    %62 = vector.load %arg7[%c0_49, %c0_50, %c0_51] : memref<5x128x128xf32, #tpu.memory_space<vmem>>, vector<1x128x128xf32>
    %63 = vector.shape_cast %62 : vector<1x128x128xf32> to vector<128x128xf32>
    %cst_52 = arith.constant dense<0.000000e+00> : vector<8x128xf32>
    %64 = tpu.matmul %61, %63, %cst_52 {dimension_numbers = #tpu.dot_dimension_numbers<[1], [0], [0], [1], [0, 0, 1, 1], [], []>} : vector<8x128xf32>, vector<128x128xf32>, vector<8x128xf32> -> vector<8x128xf32>
    %c1_53 = arith.constant 1 : index
    %c0_54 = arith.constant 0 : index
    %c0_55 = arith.constant 0 : index
    %65 = vector.load %arg6[%c1_53, %c0_54, %c0_55] : memref<5x8x16xf32, #tpu.memory_space<vmem>>, vector<1x8x16xf32>
    %66 = vector.shape_cast %65 : vector<1x8x16xf32> to vector<8x16xf32>
    %cst_56 = arith.constant dense<0.000000e+00> : vector<8x128xf32>
    %67 = tpu.matmul %66, %58, %cst_56 {dimension_numbers = #tpu.dot_dimension_numbers<[1], [0], [0], [1], [0, 0, 1, 1], [], []>} : vector<8x16xf32>, vector<16x128xf32>, vector<8x128xf32> -> vector<8x128xf32>
    %c1_57 = arith.constant 1 : index
    %c0_58 = arith.constant 0 : index
    %c0_59 = arith.constant 0 : index
    %68 = vector.load %arg7[%c1_57, %c0_58, %c0_59] : memref<5x128x128xf32, #tpu.memory_space<vmem>>, vector<1x128x128xf32>
    %69 = vector.shape_cast %68 : vector<1x128x128xf32> to vector<128x128xf32>
    %cst_60 = arith.constant dense<0.000000e+00> : vector<8x128xf32>
    %70 = tpu.matmul %67, %69, %cst_60 {dimension_numbers = #tpu.dot_dimension_numbers<[1], [0], [0], [1], [0, 0, 1, 1], [], []>} : vector<8x128xf32>, vector<128x128xf32>, vector<8x128xf32> -> vector<8x128xf32>
    %71 = arith.addf %64, %70 : vector<8x128xf32>
    %c2_61 = arith.constant 2 : index
    %c0_62 = arith.constant 0 : index
    %c0_63 = arith.constant 0 : index
    %72 = vector.load %arg6[%c2_61, %c0_62, %c0_63] : memref<5x8x16xf32, #tpu.memory_space<vmem>>, vector<1x8x16xf32>
    %73 = vector.shape_cast %72 : vector<1x8x16xf32> to vector<8x16xf32>
    %cst_64 = arith.constant dense<0.000000e+00> : vector<8x128xf32>
    %74 = tpu.matmul %73, %58, %cst_64 {dimension_numbers = #tpu.dot_dimension_numbers<[1], [0], [0], [1], [0, 0, 1, 1], [], []>} : vector<8x16xf32>, vector<16x128xf32>, vector<8x128xf32> -> vector<8x128xf32>
    %c2_65 = arith.constant 2 : index
    %c0_66 = arith.constant 0 : index
    %c0_67 = arith.constant 0 : index
    %75 = vector.load %arg7[%c2_65, %c0_66, %c0_67] : memref<5x128x128xf32, #tpu.memory_space<vmem>>, vector<1x128x128xf32>
    %76 = vector.shape_cast %75 : vector<1x128x128xf32> to vector<128x128xf32>
    %cst_68 = arith.constant dense<0.000000e+00> : vector<8x128xf32>
    %77 = tpu.matmul %74, %76, %cst_68 {dimension_numbers = #tpu.dot_dimension_numbers<[1], [0], [0], [1], [0, 0, 1, 1], [], []>} : vector<8x128xf32>, vector<128x128xf32>, vector<8x128xf32> -> vector<8x128xf32>
    %78 = arith.addf %71, %77 : vector<8x128xf32>
    %c3_69 = arith.constant 3 : index
    %c0_70 = arith.constant 0 : index
    %c0_71 = arith.constant 0 : index
    %79 = vector.load %arg6[%c3_69, %c0_70, %c0_71] : memref<5x8x16xf32, #tpu.memory_space<vmem>>, vector<1x8x16xf32>
    %80 = vector.shape_cast %79 : vector<1x8x16xf32> to vector<8x16xf32>
    %cst_72 = arith.constant dense<0.000000e+00> : vector<8x128xf32>
    %81 = tpu.matmul %80, %58, %cst_72 {dimension_numbers = #tpu.dot_dimension_numbers<[1], [0], [0], [1], [0, 0, 1, 1], [], []>} : vector<8x16xf32>, vector<16x128xf32>, vector<8x128xf32> -> vector<8x128xf32>
    %c3_73 = arith.constant 3 : index
    %c0_74 = arith.constant 0 : index
    %c0_75 = arith.constant 0 : index
    %82 = vector.load %arg7[%c3_73, %c0_74, %c0_75] : memref<5x128x128xf32, #tpu.memory_space<vmem>>, vector<1x128x128xf32>
    %83 = vector.shape_cast %82 : vector<1x128x128xf32> to vector<128x128xf32>
    %cst_76 = arith.constant dense<0.000000e+00> : vector<8x128xf32>
    %84 = tpu.matmul %81, %83, %cst_76 {dimension_numbers = #tpu.dot_dimension_numbers<[1], [0], [0], [1], [0, 0, 1, 1], [], []>} : vector<8x128xf32>, vector<128x128xf32>, vector<8x128xf32> -> vector<8x128xf32>
    %85 = arith.addf %78, %84 : vector<8x128xf32>
    %c4_77 = arith.constant 4 : index
    %c0_78 = arith.constant 0 : index
    %c0_79 = arith.constant 0 : index
    %86 = vector.load %arg6[%c4_77, %c0_78, %c0_79] : memref<5x8x16xf32, #tpu.memory_space<vmem>>, vector<1x8x16xf32>
    %87 = vector.shape_cast %86 : vector<1x8x16xf32> to vector<8x16xf32>
    %cst_80 = arith.constant dense<0.000000e+00> : vector<8x128xf32>
    %88 = tpu.matmul %87, %58, %cst_80 {dimension_numbers = #tpu.dot_dimension_numbers<[1], [0], [0], [1], [0, 0, 1, 1], [], []>} : vector<8x16xf32>, vector<16x128xf32>, vector<8x128xf32> -> vector<8x128xf32>
    %c4_81 = arith.constant 4 : index
    %c0_82 = arith.constant 0 : index
    %c0_83 = arith.constant 0 : index
    %89 = vector.load %arg7[%c4_81, %c0_82, %c0_83] : memref<5x128x128xf32, #tpu.memory_space<vmem>>, vector<1x128x128xf32>
    %90 = vector.shape_cast %89 : vector<1x128x128xf32> to vector<128x128xf32>
    %cst_84 = arith.constant dense<0.000000e+00> : vector<8x128xf32>
    %91 = tpu.matmul %88, %90, %cst_84 {dimension_numbers = #tpu.dot_dimension_numbers<[1], [0], [0], [1], [0, 0, 1, 1], [], []>} : vector<8x128xf32>, vector<128x128xf32>, vector<8x128xf32> -> vector<8x128xf32>
    %92 = arith.addf %85, %91 : vector<8x128xf32>
    %c0_85 = arith.constant 0 : index
    %c0_86 = arith.constant 0 : index
    %93 = vector.load %arg8[%c0_85, %c0_86] : memref<1x128xf32, #tpu.memory_space<vmem>>, vector<1x128xf32>
    %94 = vector.broadcast %93 : vector<1x128xf32> to vector<8x128xf32>
    %95 = arith.addf %92, %94 : vector<8x128xf32>
    %cst_87 = arith.constant 0.000000e+00 : f32
    %96 = vector.broadcast %cst_87 : f32 to vector<8x128xf32>
    %97 = arith.maximumf %95, %96 : vector<8x128xf32>
    %c0_88 = arith.constant 0 : index
    %c0_89 = arith.constant 0 : index
    %98 = vector.load %arg9[%c0_88, %c0_89] : memref<128x128xf32, #tpu.memory_space<vmem>>, vector<128x128xf32>
    %cst_90 = arith.constant dense<0.000000e+00> : vector<8x128xf32>
    %99 = tpu.matmul %97, %98, %cst_90 {dimension_numbers = #tpu.dot_dimension_numbers<[1], [0], [0], [1], [0, 0, 1, 1], [], []>} : vector<8x128xf32>, vector<128x128xf32>, vector<8x128xf32> -> vector<8x128xf32>
    %c0_91 = arith.constant 0 : index
    %c0_92 = arith.constant 0 : index
    %100 = vector.load %arg10[%c0_91, %c0_92] : memref<1x128xf32, #tpu.memory_space<vmem>>, vector<1x128xf32>
    %101 = vector.broadcast %100 : vector<1x128xf32> to vector<8x128xf32>
    %102 = arith.addf %99, %101 : vector<8x128xf32>
    %cst_93 = arith.constant 0.000000e+00 : f32
    %103 = vector.broadcast %cst_93 : f32 to vector<8x128xf32>
    %104 = arith.maximumf %102, %103 : vector<8x128xf32>
    %c0_94 = arith.constant 0 : index
    %c0_95 = arith.constant 0 : index
    %105 = vector.load %arg11[%c0_94, %c0_95] : memref<128x128xf32, #tpu.memory_space<vmem>>, vector<128x128xf32>
    %cst_96 = arith.constant dense<0.000000e+00> : vector<8x128xf32>
    %106 = tpu.matmul %104, %105, %cst_96 {dimension_numbers = #tpu.dot_dimension_numbers<[1], [0], [0], [1], [0, 0, 1, 1], [], []>} : vector<8x128xf32>, vector<128x128xf32>, vector<8x128xf32> -> vector<8x128xf32>
    %c0_97 = arith.constant 0 : index
    %c0_98 = arith.constant 0 : index
    %107 = vector.load %arg12[%c0_97, %c0_98] : memref<1x128xf32, #tpu.memory_space<vmem>>, vector<1x128xf32>
    %108 = vector.broadcast %107 : vector<1x128xf32> to vector<8x128xf32>
    %109 = arith.addf %106, %108 : vector<8x128xf32>
    %c0_99 = arith.constant 0 : index
    %c0_100 = arith.constant 0 : index
    %110 = vector.load %arg13[%c0_99, %c0_100] : memref<8x128xf32, #tpu.memory_space<vmem>>, vector<8x128xf32>
    tpu.vector_store %arg13[%c0_99, %c0_100], %109 {strides = array<i32>} : memref<8x128xf32, #tpu.memory_space<vmem>>, vector<8x128xf32>,
    return
  }
}

</mosaic_0001>

<bundles_post_ra>
// kernel: cnn_forward.1
= control target key start
LH: loop header
LB: loop body
LE: loop exit
PB: predicated region body
PF: predicated region fallthrough
CT: control target
= control target key end

     0   :  { %vm208_vm0 = vcmask 785408   ;;  %vm491_vm1 = vcmask 261120   ;;  %vm4021_vm2 = vmmov 0   ;;  %vm1665_vm3 = vcmask 130048   ;;  %s5677_s1 = inlined_call_operand.vmem [shape: f32[480,256], index: 1, kind: input, shape index: {}]   ;;  %s5678_s0 = inlined_call_operand.vmem [shape: f32[64,480], index: 0, kind: input, shape index: {}]   ;;  %s5679_s3 = inlined_call_operand.vmem [shape: f32[5,32,32], index: 3, kind: input, shape index: {}]   ;;  %s5680_s2 = inlined_call_operand.vmem [shape: f32[1,256], index: 2, kind: input, shape index: {}]   ;;  %s5681_s4 = inlined_call_operand.vmem [shape: f32[5,128,256], index: 4, kind: input, shape index: {}]   ;;  %s5682_s5 = inlined_call_operand.vmem [shape: f32[1,256], index: 5, kind: input, shape index: {}]   ;;  %s5683_s7 = inlined_call_operand.vmem [shape: f32[5,128,128], index: 7, kind: input, shape index: {}]   ;;  %s5684_s6 = inlined_call_operand.vmem [shape: f32[5,8,16], index: 6, kind: input, shape index: {}]   ;;  %s5685_s9 = inlined_call_operand.vmem [shape: f32[128,128], index: 9, kind: input, shape index: {}]   ;;  %s5686_s11 = inlined_call_operand.vmem [shape: f32[128,128], index: 11, kind: input, shape index: {}]   ;;  %s5687_s8 = inlined_call_operand.vmem [shape: f32[1,128], index: 8, kind: input, shape index: {}]   ;;  %s5688_s10 = inlined_call_operand.vmem [shape: f32[1,128], index: 10, kind: input, shape index: {}]   ;;  %s5689_s12 = inlined_call_operand.vmem [shape: f32[1,128], index: 12, kind: input, shape index: {}]   ;;  %s5690_s13 = inlined_call_operand.vmem [shape: f32[8,128], index: 13, kind: output, shape index: {}]  }
   0x1   :  { %v77_v0 = vld [vmem:[%s5677_s1 + $0x8] sm:$0xff]  ;;  %v79_v1 = vld [vmem:[%s5677_s1 + $0x18] sm:$0xff]  ;;  %v76_v2 = vld [vmem:[%s5677_s1] sm:$0xff] }
   0x2   :  { %v3449_v3 = vpack.c.bf16 %v79_v1, %v77_v0  ;;  %v78_v4 = vld [vmem:[%s5677_s1 + $0x10] sm:$0xff]  ;;  %v81_v5 = vld [vmem:[%s5677_s1 + $0x28] sm:$0xff]  ;;  %v83_v6 = vld [vmem:[%s5677_s1 + $0x38] sm:$0xff] }
   0x3   :  { %v3451_v7 = vpack.c.bf16 %v78_v4, %v76_v2  ;;  %v3453_v8 = vpack.c.bf16 %v83_v6, %v81_v5  ;;  %v80_v9 = vld [vmem:[%s5677_s1 + $0x20] sm:$0xff]  ;;  %v82_v10 = vld [vmem:[%s5677_s1 + $0x30] sm:$0xff]  ;;  %v85_v11 = vld [vmem:[%s5677_s1 + $0x48] sm:$0xff] }
   0x4   :  { %3450 = vmatprep.subr.bf16.mxu0 %v3449_v3  ;;  %v87_v12 = vld [vmem:[%s5677_s1 + $0x58] sm:$0xff]  ;;  %v3455_v13 = vpack.c.bf16 %v82_v10, %v80_v9  ;;  %v84_v15 = vld [vmem:[%s5677_s1 + $0x40] sm:$0xff]  ;;  %v86_v16 = vld [vmem:[%s5677_s1 + $0x50] sm:$0xff] }
   0x5   :  { %3452 = vmatpush1.bf16.msra.mxu0 %v3451_v7  ;;  %v3457_v14 = vpack.c.bf16 %v87_v12, %v85_v11  ;;  %v89_v17 = vld [vmem:[%s5677_s1 + $0x68] sm:$0xff]  ;;  %v91_v18 = vld [vmem:[%s5677_s1 + $0x78] sm:$0xff]  ;;  %v3459_v19 = vpack.c.bf16 %v86_v16, %v84_v15  ;;  %v88_v21 = vld [vmem:[%s5677_s1 + $0x60] sm:$0xff] }
   0x6   :  { %3454 = vmatprep.subr.bf16.mxu0 %v3453_v8  ;;  %v3461_v20 = vpack.c.bf16 %v91_v18, %v89_v17  ;;  %v90_v22 = vld [vmem:[%s5677_s1 + $0x70] sm:$0xff]  ;;  %v93_v23 = vld [vmem:[%s5677_s1 + $0x88] sm:$0xff]  ;;  %v95_v24 = vld [vmem:[%s5677_s1 + $0x98] sm:$0xff] }
   0x7   :  { %v3463_v25 = vpack.c.bf16 %v90_v22, %v88_v21  ;;  %v3465_v26 = vpack.c.bf16 %v95_v24, %v93_v23  ;;  %v92_v27 = vld [vmem:[%s5677_s1 + $0x80] sm:$0xff]  ;;  %v94_v28 = vld [vmem:[%s5677_s1 + $0x90] sm:$0xff]  ;;  %v97_v29 = vld [vmem:[%s5677_s1 + $0xa8] sm:$0xff] }
   0x8   :  { %v99_v30 = vld [vmem:[%s5677_s1 + $0xb8] sm:$0xff]  ;;  %v3467_v31 = vpack.c.bf16 %v94_v28, %v92_v27  ;;  %v96_v33 = vld [vmem:[%s5677_s1 + $0xa0] sm:$0xff]  ;;  %v98_v34 = vld [vmem:[%s5677_s1 + $0xb0] sm:$0xff] }
   0x9   :  { %3456 = vmatpush1.bf16.msra.mxu0 %v3455_v13  ;;  %v3469_v32 = vpack.c.bf16 %v99_v30, %v97_v29  ;;  %v101_v35 = vld [vmem:[%s5677_s1 + $0xc8] sm:$0xff]  ;;  %v103_v36 = vld [vmem:[%s5677_s1 + $0xd8] sm:$0xff]  ;;  %v3471_v37 = vpack.c.bf16 %v98_v34, %v96_v33  ;;  %v100_v39 = vld [vmem:[%s5677_s1 + $0xc0] sm:$0xff] }
   0xa   :  { %3458 = vmatprep.subr.bf16.mxu0 %v3457_v14  ;;  %v3473_v38 = vpack.c.bf16 %v103_v36, %v101_v35  ;;  %v102_v40 = vld [vmem:[%s5677_s1 + $0xd0] sm:$0xff]  ;;  %v45_v41 = vld [vmem:[%s5678_s0 + $0x8] sm:$0xff]  ;;  %v107_v43 = vld [vmem:[%s5677_s1 + $0xf8] sm:$0xff] }
   0xb   :  { %v105_v42 = vld [vmem:[%s5677_s1 + $0xe8] sm:$0xff]  ;;  %297 = vmatprep.mubr.f32.mxu0 %v45_v41  ;;  %v3475_v44 = vpack.c.bf16 %v102_v40, %v100_v39  ;;  %v104_v46 = vld [vmem:[%s5677_s1 + $0xe0] sm:$0xff]  ;;  %v106_v47 = vld [vmem:[%s5677_s1 + $0xf0] sm:$0xff] }
   0xc   :  { %v3477_v45 = vpack.c.bf16 %v107_v43, %v105_v42  ;;  %v109_v48 = vld [vmem:[%s5677_s1 + $0x108] sm:$0xff]  ;;  %v111_v49 = vld [vmem:[%s5677_s1 + $0x118] sm:$0xff]  ;;  %v3479_v50 = vpack.c.bf16 %v106_v47, %v104_v46  ;;  %v108_v52 = vld [vmem:[%s5677_s1 + $0x100] sm:$0xff] }
   0xd   :  { %3460 = vmatpush1.bf16.msra.mxu0 %v3459_v19  ;;  %v3481_v51 = vpack.c.bf16 %v111_v49, %v109_v48  ;;  %v110_v53 = vld [vmem:[%s5677_s1 + $0x110] sm:$0xff]  ;;  %v113_v54 = vld [vmem:[%s5677_s1 + $0x128] sm:$0xff]  ;;  %v115_v55 = vld [vmem:[%s5677_s1 + $0x138] sm:$0xff] }
   0xe   :  { %3462 = vmatprep.subr.bf16.mxu0 %v3461_v20  ;;  %v3483_v56 = vpack.c.bf16 %v110_v53, %v108_v52  ;;  %v3485_v57 = vpack.c.bf16 %v115_v55, %v113_v54  ;;  %v112_v58 = vld [vmem:[%s5677_s1 + $0x120] sm:$0xff]  ;;  %v114_v59 = vld [vmem:[%s5677_s1 + $0x130] sm:$0xff]  ;;  %v117_v60 = vld [vmem:[%s5677_s1 + $0x148] sm:$0xff] }
   0xf   :  { %v119_v61 = vld [vmem:[%s5677_s1 + $0x158] sm:$0xff]  ;;  %v3487_v62 = vpack.c.bf16 %v114_v59, %v112_v58  ;;  %v116_v0 = vld [vmem:[%s5677_s1 + $0x140] sm:$0xff]  ;;  %v118_v1 = vld [vmem:[%s5677_s1 + $0x150] sm:$0xff] }
  0x10   :  { %v3489_v63 = vpack.c.bf16 %v119_v61, %v117_v60  ;;  %v121_v2 = vld [vmem:[%s5677_s1 + $0x168] sm:$0xff]  ;;  %v123_v3 = vld [vmem:[%s5677_s1 + $0x178] sm:$0xff]  ;;  %v3491_v4 = vpack.c.bf16 %v118_v1, %v116_v0  ;;  %v120_v6 = vld [vmem:[%s5677_s1 + $0x160] sm:$0xff] }
  0x11   :  { %3464 = vmatpush1.bf16.msra.mxu0 %v3463_v25  ;;  %v3493_v5 = vpack.c.bf16 %v123_v3, %v121_v2  ;;  %v122_v7 = vld [vmem:[%s5677_s1 + $0x170] sm:$0xff]  ;;  %v125_v8 = vld [vmem:[%s5677_s1 + $0x188] sm:$0xff]  ;;  %v127_v9 = vld [vmem:[%s5677_s1 + $0x198] sm:$0xff] }
  0x12   :  { %3466 = vmatprep.subr.bf16.mxu0 %v3465_v26  ;;  %v3495_v10 = vpack.c.bf16 %v122_v7, %v120_v6  ;;  %v3497_v11 = vpack.c.bf16 %v127_v9, %v125_v8  ;;  %v124_v12 = vld [vmem:[%s5677_s1 + $0x180] sm:$0xff]  ;;  %v126_v13 = vld [vmem:[%s5677_s1 + $0x190] sm:$0xff]  ;;  %v129_v14 = vld [vmem:[%s5677_s1 + $0x1a8] sm:$0xff] }
  0x13   :  { %v131_v15 = vld [vmem:[%s5677_s1 + $0x1b8] sm:$0xff]  ;;  %v3499_v16 = vpack.c.bf16 %v126_v13, %v124_v12  ;;  %v128_v18 = vld [vmem:[%s5677_s1 + $0x1a0] sm:$0xff]  ;;  %v130_v19 = vld [vmem:[%s5677_s1 + $0x1b0] sm:$0xff] }
  0x14   :  { %v3501_v17 = vpack.c.bf16 %v131_v15, %v129_v14  ;;  %v133_v20 = vld [vmem:[%s5677_s1 + $0x1c8] sm:$0xff]  ;;  %v135_v21 = vld [vmem:[%s5677_s1 + $0x1d8] sm:$0xff]  ;;  %v3503_v22 = vpack.c.bf16 %v130_v19, %v128_v18  ;;  %v132_v24 = vld [vmem:[%s5677_s1 + $0x1c0] sm:$0xff] }
  0x15   :  { %3468 = vmatpush1.bf16.msra.mxu0 %v3467_v31  ;;  %v3505_v23 = vpack.c.bf16 %v135_v21, %v133_v20  ;;  %v134_v25 = vld [vmem:[%s5677_s1 + $0x1d0] sm:$0xff]  ;;  %v137_v26 = vld [vmem:[%s5677_s1 + $0x1e8] sm:$0xff]  ;;  %v139_v27 = vld [vmem:[%s5677_s1 + $0x1f8] sm:$0xff] }
  0x16   :  { %3470 = vmatprep.subr.bf16.mxu0 %v3469_v32  ;;  %v3507_v28 = vpack.c.bf16 %v134_v25, %v132_v24  ;;  %v3509_v29 = vpack.c.bf16 %v139_v27, %v137_v26  ;;  %v136_v30 = vld [vmem:[%s5677_s1 + $0x1e0] sm:$0xff]  ;;  %v138_v31 = vld [vmem:[%s5677_s1 + $0x1f0] sm:$0xff]  ;;  %v141_v32 = vld [vmem:[%s5677_s1 + $0x208] sm:$0xff] }
  0x17   :  { %v143_v33 = vld [vmem:[%s5677_s1 + $0x218] sm:$0xff]  ;;  %v3511_v34 = vpack.c.bf16 %v138_v31, %v136_v30  ;;  %v140_v36 = vld [vmem:[%s5677_s1 + $0x200] sm:$0xff]  ;;  %v149_v46 = vld [vmem:[%s5677_s1 + $0x248] sm:$0xff] }
  0x18   :  { %v3513_v35 = vpack.c.bf16 %v143_v33, %v141_v32  ;;  %v147_v39 = vld [vmem:[%s5677_s1 + $0x238] sm:$0xff]  ;;  %v44_v40 = vld [vmem:[%s5678_s0] sm:$0xff]  ;;  %v150_v52 = vld [vmem:[%s5677_s1 + $0x250] sm:$0xff] }
  0x19   :  { %3472 = vmatpush1.bf16.msra.mxu0 %v3471_v37  ;;  %v142_v37 = vld [vmem:[%s5677_s1 + $0x210] sm:$0xff]  ;;  %v144_v43 = vld [vmem:[%s5677_s1 + $0x220] sm:$0xff]  ;;  %v151_v47 = vld [vmem:[%s5677_s1 + $0x258] sm:$0xff] }
  0x1a   :  { %3474 = vmatprep.subr.bf16.mxu0 %v3473_v38  ;;  %v145_v38 = vld [vmem:[%s5677_s1 + $0x228] sm:$0xff]  ;;  %v3515_v41 = vpack.c.bf16 %v142_v37, %v140_v36  ;;  %v48_v49 = vld [vmem:[%s5678_s0 + $0x20] sm:$0xff]  ;;  %v155_v55 = vld [vmem:[%s5677_s1 + $0x278] sm:$0xff] }
  0x1b   :  { %v3517_v42 = vpack.c.bf16 %v147_v39, %v145_v38  ;;  %v53_v53 = vld [vmem:[%s5678_s0 + $0x48] sm:$0xff]  ;;  %v152_v59 = vld [vmem:[%s5677_s1 + $0x260] sm:$0xff]  ;;  %v154_v60 = vld [vmem:[%s5677_s1 + $0x270] sm:$0xff] }
  0x1c   :  { %v153_v54 = vld [vmem:[%s5677_s1 + $0x268] sm:$0xff]  ;;  %v3527_v0 = vpack.c.bf16 %v154_v60, %v152_v59  ;;  %v56_v1 = vld [vmem:[%s5678_s0 + $0x60] sm:$0xff]  ;;  %v163_v7 = vld [vmem:[%s5677_s1 + $0x2b8] sm:$0xff] }
  0x1d   :  { %3476 = vmatpush1.bf16.msra.mxu0 %v3475_v44  ;;  %v146_v44 = vld [vmem:[%s5677_s1 + $0x230] sm:$0xff]  ;;  %v3525_v58 = vpack.c.bf16 %v155_v55, %v153_v54  ;;  %v57_v61 = vld [vmem:[%s5678_s0 + $0x68] sm:$0xff]  ;;  %v156_v3 = vld [vmem:[%s5677_s1 + $0x280] sm:$0xff] }
  0x1e   :  { %3478 = vmatprep.subr.bf16.mxu0 %v3477_v45  ;;  %v49_v45 = vld [vmem:[%s5678_s0 + $0x28] sm:$0xff]  ;;  %v3519_v48 = vpack.c.bf16 %v146_v44, %v144_v43  ;;  %v60_v9 = vld [vmem:[%s5678_s0 + $0x80] sm:$0xff]  ;;  %v162_v12 = vld [vmem:[%s5677_s1 + $0x2b0] sm:$0xff] }
  0x1f   :  { %v161_v6 = vld [vmem:[%s5677_s1 + $0x2a8] sm:$0xff]  ;;  %v167_v15 = vld [vmem:[%s5677_s1 + $0x2d8] sm:$0xff]  ;;  %v164_v19 = vld [vmem:[%s5677_s1 + $0x2c0] sm:$0xff] }
  0x20   :  { %v65_v13 = vld [vmem:[%s5678_s0 + $0xa8] sm:$0xff]  ;;  %v166_v20 = vld [vmem:[%s5677_s1 + $0x2d0] sm:$0xff]  ;;  %v68_v25 = vld [vmem:[%s5678_s0 + $0xc0] sm:$0xff] }
  0x21   :  { %3480 = vmatpush1.bf16.msra.mxu0 %v3479_v50  ;;  %v3521_v50 = vpack.c.bf16 %v151_v47, %v149_v46  ;;  %v165_v14 = vld [vmem:[%s5677_s1 + $0x2c8] sm:$0xff]  ;;  %v3539_v24 = vpack.c.bf16 %v166_v20, %v164_v19  ;;  %v168_v27 = vld [vmem:[%s5677_s1 + $0x2e0] sm:$0xff]  ;;  %v175_v31 = vld [vmem:[%s5677_s1 + $0x318] sm:$0xff] }
  0x22   :  { %3482 = vmatprep.subr.bf16.mxu0 %v3481_v51  ;;  %v148_v51 = vld [vmem:[%s5677_s1 + $0x240] sm:$0xff]  ;;  %v3537_v18 = vpack.c.bf16 %v167_v15, %v165_v14  ;;  %v69_v21 = vld [vmem:[%s5678_s0 + $0xc8] sm:$0xff]  ;;  %v174_v36 = vld [vmem:[%s5677_s1 + $0x310] sm:$0xff] }
  0x23   :  { %v173_v30 = vld [vmem:[%s5677_s1 + $0x308] sm:$0xff]  ;;  %v72_v33 = vld [vmem:[%s5678_s0 + $0xe0] sm:$0xff]  ;;  %v47_v37 = vld [vmem:[%s5678_s0 + $0x18] sm:$0xff] }
  0x24   :  { %v177_v38 = vld [vmem:[%s5677_s1 + $0x328] sm:$0xff]  ;;  %v179_v39 = vld [vmem:[%s5677_s1 + $0x338] sm:$0xff]  ;;  %v178_v43 = vld [vmem:[%s5677_s1 + $0x330] sm:$0xff] }
  0x25   :  { %3484 = vmatpush1.bf16.msra.mxu0 %v3483_v56  ;;  %v3523_v56 = vpack.c.bf16 %v150_v52, %v148_v51  ;;  %v181_v44 = vld [vmem:[%s5677_s1 + $0x348] sm:$0xff]  ;;  %v187_v51 = vld [vmem:[%s5677_s1 + $0x378] sm:$0xff]  ;;  %v184_v54 = vld [vmem:[%s5677_s1 + $0x360] sm:$0xff] }
  0x26   :  { %3486 = vmatprep.subr.bf16.mxu0 %v3485_v57  ;;  %v52_v57 = vld [vmem:[%s5678_s0 + $0x40] sm:$0xff]  ;;  %v186_v55 = vld [vmem:[%s5677_s1 + $0x370] sm:$0xff]  ;;  %v67_v14 = vld [vmem:[%s5678_s0 + $0xb8] sm:$0xff] }
  0x27   :  { %v188_v60 = vld [vmem:[%s5677_s1 + $0x380] sm:$0xff]  ;;  %v66_v15 = vld [vmem:[%s5678_s0 + $0xb0] sm:$0xff] }
  0x28   :  { %v74_v19 = vld [vmem:[%s5678_s0 + $0xf0] sm:$0xff]  ;;  %v487_v20 = vld [vmem:[%s5679_s3] sm:$0xff] }
  0x29   :  { %3488 = vmatpush1.bf16.msra.mxu0 %v3487_v62  ;;  %v157_v62 = vld [vmem:[%s5677_s1 + $0x288] sm:$0xff]  ;;  %3107 = vmatprep.mubr.msk.f32.mxu1 %vm491_vm1, %v487_v20 }
  0x2a   :  { %3490 = vmatprep.subr.bf16.mxu0 %v3489_v63  ;;  %v159_v63 = vld [vmem:[%s5677_s1 + $0x298] sm:$0xff] }
  0x2b   :  { %v3529_v2 = vpack.c.bf16 %v159_v63, %v157_v62  ;;  %v193_v62 = vld [vmem:[%s5677_s1 + $0x3a8] sm:$0xff]  ;;  %v195_v63 = vld [vmem:[%s5677_s1 + $0x3b8] sm:$0xff] }
  0x2d   :  { %3492 = vmatpush1.bf16.msra.mxu0 %v3491_v4  ;;  %v158_v4 = vld [vmem:[%s5677_s1 + $0x290] sm:$0xff] }
  0x2e   :  { %3494 = vmatprep.subr.bf16.mxu0 %v3493_v5  ;;  %v61_v5 = vld [vmem:[%s5678_s0 + $0x88] sm:$0xff]  ;;  %v3531_v8 = vpack.c.bf16 %v158_v4, %v156_v3  ;;  %v194_v3 = vld [vmem:[%s5677_s1 + $0x3b0] sm:$0xff] }
  0x31   :  { %3496 = vmatpush1.bf16.msra.mxu0 %v3495_v10  ;;  %v3533_v10 = vpack.c.bf16 %v163_v7, %v161_v6  ;;  %v51_v6 = vld [vmem:[%s5678_s0 + $0x38] sm:$0xff]  ;;  %v50_v7 = vld [vmem:[%s5678_s0 + $0x30] sm:$0xff] }
  0x32   :  { %3498 = vmatprep.subr.bf16.mxu0 %v3497_v11  ;;  %v160_v11 = vld [vmem:[%s5677_s1 + $0x2a0] sm:$0xff] }
  0x35   :  { %3500 = vmatpush1.bf16.msra.mxu0 %v3499_v16  ;;  %v3535_v16 = vpack.c.bf16 %v162_v12, %v160_v11  ;;  %v58_v11 = vld [vmem:[%s5678_s0 + $0x70] sm:$0xff]  ;;  %v63_v12 = vld [vmem:[%s5678_s0 + $0x98] sm:$0xff] }
  0x36   :  { %3502 = vmatprep.subr.bf16.mxu0 %v3501_v17  ;;  %v64_v17 = vld [vmem:[%s5678_s0 + $0xa0] sm:$0xff] }
  0x39   :  { %3504 = vmatpush1.bf16.msra.mxu0 %v3503_v22  ;;  %v169_v22 = vld [vmem:[%s5677_s1 + $0x2e8] sm:$0xff] }
  0x3a   :  { %3506 = vmatprep.subr.bf16.mxu0 %v3505_v23  ;;  %v171_v23 = vld [vmem:[%s5677_s1 + $0x2f8] sm:$0xff] }
  0x3b   :  { %v3541_v26 = vpack.c.bf16 %v171_v23, %v169_v22  ;;  %v198_v22 = vlaneseq }
  0x3d   :  { %3508 = vmatpush1.bf16.msra.mxu0 %v3507_v28  ;;  %v170_v28 = vld [vmem:[%s5677_s1 + $0x2f0] sm:$0xff] }
  0x3e   :  { %3510 = vmatprep.subr.bf16.mxu0 %v3509_v29  ;;  %v73_v29 = vld [vmem:[%s5678_s0 + $0xe8] sm:$0xff]  ;;  %v3543_v32 = vpack.c.bf16 %v170_v28, %v168_v27 }
  0x41   :  { %3512 = vmatpush1.bf16.msra.mxu0 %v3511_v34  ;;  %v3545_v34 = vpack.c.bf16 %v175_v31, %v173_v30 }
  0x42   :  { %3514 = vmatprep.subr.bf16.mxu0 %v3513_v35  ;;  %v172_v35 = vld [vmem:[%s5677_s1 + $0x300] sm:$0xff] }
  0x44   :  { %298 = vmatmul.mubr.f32.vlgmr.msra.gmra.mrb[0].mxu0 %v44_v40  ;;  %v3547_v40 = vpack.c.bf16 %v174_v36, %v172_v35 }
  0x45   :  { %3516 = vmatpush1.bf16.msra.mxu0 %v3515_v41  ;;  %303 = vmatprep.mubr.f32.mxu0 %v49_v45  ;;  %v3549_v41 = vpack.c.bf16 %v179_v39, %v177_v38  ;;  %v183_v45 = vld [vmem:[%s5677_s1 + $0x358] sm:$0xff] }
  0x46   :  { %3518 = vmatprep.subr.bf16.mxu0 %v3517_v42  ;;  %v176_v42 = vld [vmem:[%s5677_s1 + $0x320] sm:$0xff]  ;;  %v3553_v47 = vpack.c.bf16 %v183_v45, %v181_v44 }
  0x47   :  { %v3551_v46 = vpack.c.bf16 %v178_v43, %v176_v42 }
  0x48   :  { %304 = vmatmul.mubr.f32.gmra.mrb[2].mxu0 %v48_v49  ;;  %v182_v49 = vld [vmem:[%s5677_s1 + $0x350] sm:$0xff] }
  0x49   :  { %3520 = vmatpush1.bf16.msra.mxu0 %v3519_v48  ;;  %309 = vmatprep.mubr.f32.mxu0 %v53_v53  ;;  %v180_v48 = vld [vmem:[%s5677_s1 + $0x340] sm:$0xff] }
  0x4a   :  { %3522 = vmatprep.subr.bf16.mxu0 %v3521_v50  ;;  %v185_v50 = vld [vmem:[%s5677_s1 + $0x368] sm:$0xff]  ;;  %v3555_v52 = vpack.c.bf16 %v182_v49, %v180_v48 }
  0x4b   :  { %v3557_v53 = vpack.c.bf16 %v187_v51, %v185_v50 }
  0x4c   :  { %310 = vmatmul.mubr.f32.gmra.mrb[4].mxu0 %v52_v57  ;;  %v191_v57 = vld [vmem:[%s5677_s1 + $0x398] sm:$0xff] }
  0x4d   :  { %3524 = vmatpush1.bf16.msra.mxu0 %v3523_v56  ;;  %315 = vmatprep.mubr.f32.mxu0 %v57_v61  ;;  %v189_v56 = vld [vmem:[%s5677_s1 + $0x388] sm:$0xff]  ;;  %v190_v61 = vld [vmem:[%s5677_s1 + $0x390] sm:$0xff] }
  0x4e   :  { %3526 = vmatprep.subr.bf16.mxu0 %v3525_v58  ;;  %v3559_v58 = vpack.c.bf16 %v186_v55, %v184_v54  ;;  %v3561_v59 = vpack.c.bf16 %v191_v57, %v189_v56 }
  0x50   :  { %316 = vmatmul.mubr.f32.gmra.mrb[6].mxu0 %v56_v1  ;;  %v3565_v1 = vpack.c.bf16 %v195_v63, %v193_v62 }
  0x51   :  { %3528 = vmatpush1.bf16.msra.mxu0 %v3527_v0  ;;  %321 = vmatprep.mubr.f32.mxu0 %v61_v5  ;;  %v3563_v0 = vpack.c.bf16 %v190_v61, %v188_v60  ;;  %v46_v5 = vld [vmem:[%s5678_s0 + $0x10] sm:$0xff] }
  0x52   :  { %3530 = vmatprep.subr.bf16.mxu0 %v3529_v2  ;;  %v192_v2 = vld [vmem:[%s5677_s1 + $0x3a0] sm:$0xff] }
  0x53   :  { %v3567_v4 = vpack.c.bf16 %v194_v3, %v192_v2 }
  0x54   :  { %322 = vmatmul.mubr.f32.gmra.mrb[8].mxu0 %v60_v9  ;;  %v54_v9 = vld [vmem:[%s5678_s0 + $0x50] sm:$0xff] }
  0x55   :  { %3532 = vmatpush1.bf16.msra.mxu0 %v3531_v8  ;;  %327 = vmatprep.mubr.f32.mxu0 %v65_v13  ;;  %v55_v8 = vld [vmem:[%s5678_s0 + $0x58] sm:$0xff]  ;;  %v62_v13 = vld [vmem:[%s5678_s0 + $0x90] sm:$0xff] }
  0x56   :  { %3534 = vmatprep.subr.bf16.mxu0 %v3533_v10  ;;  %v59_v10 = vld [vmem:[%s5678_s0 + $0x78] sm:$0xff] }
  0x58   :  { %328 = vmatmul.mubr.f32.gmra.mrb[10].mxu0 %v64_v17  ;;  %v70_v17 = vld [vmem:[%s5678_s0 + $0xd0] sm:$0xff] }
  0x59   :  { %3536 = vmatpush1.bf16.msra.mxu0 %v3535_v16  ;;  %333 = vmatprep.mubr.f32.mxu0 %v69_v21  ;;  %v71_v16 = vld [vmem:[%s5678_s0 + $0xd8] sm:$0xff]  ;;  %v2729_v21 = vld [vmem:[%s5679_s3 + $0x40] sm:$0xff] }
  0x5a   :  { %3538 = vmatprep.subr.bf16.mxu0 %v3537_v18  ;;  %v75_v18 = vld [vmem:[%s5678_s0 + $0xf8] sm:$0xff] }
  0x5c   :  { %334 = vmatmul.mubr.f32.gmra.mrb[12].mxu0 %v68_v25  ;;  %v4564_v25 = vshrl.u32 %v198_v22, 7 }
  0x5d   :  { %3540 = vmatpush1.bf16.msra.mxu0 %v3539_v24  ;;  %339 = vmatprep.mubr.f32.mxu0 %v73_v29  ;;  %v196_v29 = vld [vmem:[%s5680_s2] sm:$0x3] }
  0x5e   :  { %3542 = vmatprep.subr.bf16.mxu0 %v3541_v26  ;;  %v200_v28 = vsub.s32 0, %v4564_v25  ;;  %v204_v30 = vsub.s32 1, %v4564_v25 }
  0x60   :  { %340 = vmatmul.mubr.f32.gmra.mrb[14].mxu0 %v72_v33  ;;  %v201_v33 = vrot.slane %v196_v29, %v200_v28 }
  0x61   :  { %3544 = vmatpush1.bf16.msra.mxu0 %v3543_v32  ;;  %2677 = vmatprep.mubr.msk.f32.mxu0 %vm208_vm0, %v47_v37 }
  0x62   :  { %3546 = vmatprep.subr.bf16.mxu0 %v3545_v34  ;;  %v205_v34 = vrot.slane %v196_v29, %v204_v30  ;;  %v488_v29 = vld [vmem:[%s5679_s3 + $0x8] sm:$0xff] }
  0x65   :  { %3548 = vmatpush1.bf16.msra.mxu0 %v3547_v40 }
  0x66   :  { %3550 = vmatprep.subr.bf16.mxu0 %v3549_v41 }
  0x69   :  { %3552 = vmatpush1.bf16.msra.mxu0 %v3551_v46 }
  0x6a   :  { %3554 = vmatprep.subr.bf16.mxu0 %v3553_v47 }
  0x6d   :  { %3556 = vmatpush1.bf16.msra.mxu0 %v3555_v52 }
  0x6e   :  { %3558 = vmatprep.subr.bf16.mxu0 %v3557_v53 }
  0x71   :  { %3560 = vmatpush1.bf16.msra.mxu0 %v3559_v58 }
  0x72   :  { %3562 = vmatprep.subr.bf16.mxu0 %v3561_v59 }
  0x75   :  { %3564 = vmatpush1.bf16.msra.mxu0 %v3563_v0 }
  0x76   :  { %3566 = vmatprep.subr.bf16.mxu0 %v3565_v1 }
  0x79   :  { %3568 = vmatpush1.bf16.msra.mxu0 %v3567_v4 }
  0x7c   :  { %411 = vmatmul.mubr.f32.vlgmr.msra.gmra.mrb[0].mxu0 %v46_v5 }
  0x7d   :  { %2678 = vmatprep.mubr.msk.f32.mxu0 %vm208_vm0, %v51_v6 }
  0x80   :  { %417 = vmatmul.mubr.f32.gmra.mrb[2].mxu0 %v50_v7 }
  0x81   :  { %2679 = vmatprep.mubr.msk.f32.mxu0 %vm208_vm0, %v55_v8 }
  0x84   :  { %423 = vmatmul.mubr.f32.gmra.mrb[4].mxu0 %v54_v9 }
  0x85   :  { %2680 = vmatprep.mubr.msk.f32.mxu0 %vm208_vm0, %v59_v10 }
  0x88   :  { %429 = vmatmul.mubr.f32.gmra.mrb[6].mxu0 %v58_v11 }
  0x89   :  { %2681 = vmatprep.mubr.msk.f32.mxu0 %vm208_vm0, %v63_v12 }
  0x8c   :  { %435 = vmatmul.mubr.f32.gmra.mrb[8].mxu0 %v62_v13 }
  0x8d   :  { %2682 = vmatprep.mubr.msk.f32.mxu0 %vm208_vm0, %v67_v14 }
  0x90   :  { %441 = vmatmul.mubr.f32.gmra.mrb[10].mxu0 %v66_v15 }
  0x91   :  { %2683 = vmatprep.mubr.msk.f32.mxu0 %vm208_vm0, %v71_v16 }
  0x94   :  { %447 = vmatmul.mubr.f32.gmra.mrb[12].mxu0 %v70_v17 }
  0x95   :  { %2684 = vmatprep.mubr.msk.f32.mxu0 %vm208_vm0, %v75_v18 }
  0x98   :  { %453 = vmatmul.mubr.f32.gmra.mrb[14].mxu0 %v74_v19 }
  0x99   :  { %3135 = vmatprep.mubr.msk.f32.mxu0 %vm491_vm1, %v2729_v21 }
 0x14f   :  { %v412_v23 = vpop.f32.mrb[0].mxu0 }
 0x150   :  { %v414_v24 = vpop.f32.mrb[1].mxu0  ;;  %v3952_v37 = vadd.f32 %v412_v23, %v201_v33 }
 0x151   :  { %v3953_v38 = vadd.f32 %v414_v24, %v205_v34 }
 0x152   :  { %v459_v43 = vmax.f32 %v3952_v37, 0.0  ;;  %v2732_v37 = vld [vmem:[%s5679_s3 + $0x58] sm:$0xff] }
 0x153   :  { %v418_v26 = vpop.f32.mrb[2].mxu0  ;;  %v460_v46 = vmax.f32 %v3953_v38, 0.0 }
 0x154   :  { %v420_v27 = vpop.f32.mrb[3].mxu0  ;;  %v3954_v44 = vadd.f32 %v418_v26, %v201_v33 }
 0x155   :  { %v3955_v47 = vadd.f32 %v420_v27, %v205_v34 }
 0x156   :  { %v461_v55 = vmax.f32 %v3954_v44, 0.0  ;;  %v2690_v44 = vld [vmem:[%s5679_s3 + $0x28] sm:$0xff] }
 0x157   :  { %v424_v31 = vpop.f32.mrb[4].mxu0  ;;  %v462_v58 = vmax.f32 %v3955_v47, 0.0 }
 0x158   :  { %v426_v32 = vpop.f32.mrb[5].mxu0  ;;  %v3956_v56 = vadd.f32 %v424_v31, %v201_v33  ;;  %v2730_v31 = vld [vmem:[%s5679_s3 + $0x48] sm:$0xff] }
 0x159   :  { %v3957_v59 = vadd.f32 %v426_v32, %v205_v34  ;;  %v2698_v32 = vld [vmem:[%s5681_s4 + $0x108] sm:$0xff] }
 0x15a   :  { %v463_v4 = vmax.f32 %v3956_v56, 0.0  ;;  %v2707_v56 = vld [vmem:[%s5681_s4 + $0x150] sm:$0xff] }
 0x15b   :  { %v430_v35 = vpop.f32.mrb[6].mxu0  ;;  %v464_v7 = vmax.f32 %v3957_v59, 0.0 }
 0x15c   :  { %v432_v36 = vpop.f32.mrb[7].mxu0  ;;  %v3958_v5 = vadd.f32 %v430_v35, %v201_v33  ;;  %v2731_v35 = vld [vmem:[%s5679_s3 + $0x50] sm:$0xff] }
 0x15d   :  { %v3959_v8 = vadd.f32 %v432_v36, %v205_v34  ;;  %v490_v36 = vld [vmem:[%s5679_s3 + $0x18] sm:$0xff] }
 0x15e   :  { %v465_v18 = vmax.f32 %v3958_v5, 0.0  ;;  %v2718_v5 = vld [vmem:[%s5681_s4 + $0x1a8] sm:$0xff] }
 0x15f   :  { %v436_v39 = vpop.f32.mrb[8].mxu0  ;;  %v466_v20 = vmax.f32 %v3959_v8, 0.0 }
 0x160   :  { %v3960_v40 = vadd.f32 %v436_v39, %v201_v33  ;;  %v438_v41 = vpop.f32.mrb[9].mxu0  ;;  %v2697_v39 = vld [vmem:[%s5681_s4 + $0x100] sm:$0xff] }
 0x161   :  { %v3961_v42 = vadd.f32 %v438_v41, %v205_v34  ;;  %v2689_v41 = vld [vmem:[%s5679_s3 + $0x20] sm:$0xff] }
 0x162   :  { %v467_v45 = vmax.f32 %v3960_v40, 0.0  ;;  %v2699_v40 = vld [vmem:[%s5681_s4 + $0x110] sm:$0xff] }
 0x163   :  { %v468_v48 = vmax.f32 %v3961_v42, 0.0  ;;  %v442_v49 = vpop.f32.mrb[10].mxu0  ;;  %v2702_v42 = vld [vmem:[%s5681_s4 + $0x128] sm:$0xff] }
 0x164   :  { %v475_v50 = vmax.f32 %v459_v43, %v467_v45  ;;  %v3962_v51 = vadd.f32 %v442_v49, %v201_v33  ;;  %v444_v52 = vpop.f32.mrb[11].mxu0  ;;  %v2704_v43 = vld [vmem:[%s5681_s4 + $0x138] sm:$0xff]  ;;  %v3587_v45 = vpack.c.bf16 %v2699_v40, %v2697_v39  ;;  %v2703_v49 = vld [vmem:[%s5681_s4 + $0x130] sm:$0xff] }
 0x165   :  { %v476_v53 = vmax.f32 %v460_v46, %v468_v48  ;;  %v3963_v54 = vadd.f32 %v444_v52, %v205_v34  ;;  %v2691_v46 = vld [vmem:[%s5679_s3 + $0x30] sm:$0xff]  ;;  %v3589_v47 = vpack.c.bf16 %v2704_v43, %v2702_v42  ;;  %v2701_v48 = vld [vmem:[%s5681_s4 + $0x120] sm:$0xff]  ;;  %v2692_v52 = vld [vmem:[%s5679_s3 + $0x38] sm:$0xff] }
 0x166   :  { %v469_v57 = vmax.f32 %v3962_v51, 0.0  ;;  %v2708_v51 = vld [vmem:[%s5681_s4 + $0x158] sm:$0xff]  ;;  %v589_v42 = vld [vmem:[%s5681_s4] sm:$0xff]  ;;  %v591_v43 = vld [vmem:[%s5681_s4 + $0x10] sm:$0xff] }
 0x167   :  { %v483_v60 = vmax.f32 %v475_v50, %v476_v53  ;;  %v470_v61 = vmax.f32 %v3963_v54, 0.0  ;;  %v448_v62 = vpop.f32.mrb[12].mxu0  ;;  %v2706_v50 = vld [vmem:[%s5681_s4 + $0x148] sm:$0xff]  ;;  %v3591_v53 = vpack.c.bf16 %v2703_v49, %v2701_v48  ;;  %v3619_v49 = vpack.c.bf16 %v591_v43, %v589_v42 }
 0x168   :  { %v477_v63 = vmax.f32 %v461_v55, %v469_v57  ;;  %v3964_v0 = vadd.f32 %v448_v62, %v201_v33  ;;  %v450_v1 = vpop.f32.mrb[13].mxu0  ;;  %v3593_v54 = vpack.c.bf16 %v2708_v51, %v2706_v50  ;;  %v2705_v55 = vld [vmem:[%s5681_s4 + $0x140] sm:$0xff]  ;;  %v2710_v57 = vld [vmem:[%s5681_s4 + $0x168] sm:$0xff]  ;;  %v2711_v62 = vld [vmem:[%s5681_s4 + $0x170] sm:$0xff] }
 0x169   :  { %v478_v2 = vmax.f32 %v462_v58, %v470_v61  ;;  %v3965_v3 = vadd.f32 %v450_v1, %v205_v34  ;;  %v2712_v58 = vld [vmem:[%s5681_s4 + $0x178] sm:$0xff]  ;;  %v3595_v59 = vpack.c.bf16 %v2707_v56, %v2705_v55  ;;  %v2709_v61 = vld [vmem:[%s5681_s4 + $0x160] sm:$0xff]  ;;  %v598_v55 = vld [vmem:[%s5681_s4 + $0x48] sm:$0xff] }
 0x16a   :  { %v471_v6 = vmax.f32 %v3964_v0, 0.0  ;;  %v2716_v0 = vld [vmem:[%s5681_s4 + $0x198] sm:$0xff]  ;;  %v3599_v1 = vpack.c.bf16 %v2711_v62, %v2709_v61  ;;  %v602_v62 = vld [vmem:[%s5681_s4 + $0x68] sm:$0xff] }
 0x16b   :  { %v484_v9 = vmax.f32 %v477_v63, %v478_v2  ;;  %v472_v10 = vmax.f32 %v3965_v3, 0.0  ;;  %v454_v11 = vpop.f32.mrb[14].mxu0  ;;  %v2714_v63 = vld [vmem:[%s5681_s4 + $0x188] sm:$0xff]  ;;  %v2713_v3 = vld [vmem:[%s5681_s4 + $0x180] sm:$0xff]  ;;  %v600_v56 = vld [vmem:[%s5681_s4 + $0x58] sm:$0xff] }
 0x16c   :  { %v479_v12 = vmax.f32 %v463_v4, %v471_v6  ;;  %v3966_v13 = vadd.f32 %v454_v11, %v201_v33  ;;  %v456_v14 = vpop.f32.mrb[15].mxu0  ;;  %v2700_v33 = vld [vmem:[%s5681_s4 + $0x118] sm:$0xff]  ;;  %v3601_v2 = vpack.c.bf16 %v2716_v0, %v2714_v63  ;;  %v2715_v4 = vld [vmem:[%s5681_s4 + $0x190] sm:$0xff] }
 0x16d   :  { %v4575_v15 = vpack.c.bf16 %v484_v9, %v483_v60  ;;  %v480_v16 = vmax.f32 %v464_v7, %v472_v10  ;;  %v3967_v17 = vadd.f32 %v456_v14, %v205_v34  ;;  %v489_v34 = vld [vmem:[%s5679_s3 + $0x10] sm:$0xff]  ;;  %v3585_v38 = vpack.c.bf16 %v2700_v33, %v2698_v32  ;;  %v2720_v6 = vld [vmem:[%s5681_s4 + $0x1b8] sm:$0xff]  ;;  %v2717_v9 = vld [vmem:[%s5681_s4 + $0x1a0] sm:$0xff] }
 0x16e   :  { %v473_v19 = vmax.f32 %v3966_v13, 0.0  ;;  %v3597_v60 = vpack.c.bf16 %v2712_v58, %v2710_v57  ;;  %v3603_v7 = vpack.c.bf16 %v2715_v4, %v2713_v3  ;;  %v3605_v8 = vpack.c.bf16 %v2720_v6, %v2718_v5  ;;  %v2719_v10 = vld [vmem:[%s5681_s4 + $0x1b0] sm:$0xff]  ;;  %v2724_v13 = vld [vmem:[%s5681_s4 + $0x1d8] sm:$0xff]  ;;  %v2809_v33 = vld [vmem:[%s5679_s3 + $0x80] sm:$0xff] }
 0x16f   :  { %v485_v21 = vmax.f32 %v479_v12, %v480_v16  ;;  %v474_v22 = vmax.f32 %v3967_v17, 0.0  ;;  %3570 = vmatprep.subr.bf16.mxu1 %v4575_v15  ;;  %3650 = vmatprep.subr.bf16.mxu0 %v4575_v15  ;;  %v3607_v11 = vpack.c.bf16 %v2719_v10, %v2717_v9  ;;  %v2722_v12 = vld [vmem:[%s5681_s4 + $0x1c8] sm:$0xff]  ;;  %v2721_v16 = vld [vmem:[%s5681_s4 + $0x1c0] sm:$0xff]  ;;  %v2723_v17 = vld [vmem:[%s5681_s4 + $0x1d0] sm:$0xff]  ;;  %v4019_v32 = vmov 0.0  }
 0x170   :  { %v481_v23 = vmax.f32 %v465_v18, %v473_v19  ;;  %3572 = vmatpush3.bf16.msra.mxu1 %v4575_v15  ;;  %3652 = vmatpush3.bf16.msra.mxu0 %v4575_v15  ;;  %v3609_v14 = vpack.c.bf16 %v2724_v13, %v2722_v12  ;;  %v3611_v18 = vpack.c.bf16 %v2723_v17, %v2721_v16  ;;  %v2726_v19 = vld [vmem:[%s5681_s4 + $0x1e8] sm:$0xff]  ;;  %v604_v63 = vld [vmem:[%s5681_s4 + $0x78] sm:$0xff]  ;;  %v601_v3 = vld [vmem:[%s5681_s4 + $0x60] sm:$0xff] }
 0x171   :  { %v482_v24 = vmax.f32 %v466_v20, %v474_v22  ;;  %v2728_v20 = vld [vmem:[%s5681_s4 + $0x1f8] sm:$0xff]  ;;  %v2725_v22 = vld [vmem:[%s5681_s4 + $0x1e0] sm:$0xff]  ;;  %v3625_v58 = vpack.c.bf16 %v600_v56, %v598_v55  ;;  %v603_v4 = vld [vmem:[%s5681_s4 + $0x70] sm:$0xff] }
 0x172   :  { %v606_v5 = vld [vmem:[%s5681_s4 + $0x88] sm:$0xff]  ;;  %v608_v6 = vld [vmem:[%s5681_s4 + $0x98] sm:$0xff]  ;;  %v605_v9 = vld [vmem:[%s5681_s4 + $0x80] sm:$0xff] }
 0x173   :  { %v486_v26 = vmax.f32 %v481_v23, %v482_v24  ;;  %v2727_v23 = vld [vmem:[%s5681_s4 + $0x1f0] sm:$0xff]  ;;  %v612_v12 = vld [vmem:[%s5681_s4 + $0xb8] sm:$0xff]  ;;  %v609_v16 = vld [vmem:[%s5681_s4 + $0xa0] sm:$0xff] }
 0x174   :  { %v3615_v24 = vpack.c.bf16 %v2727_v23, %v2725_v22  ;;  %v607_v10 = vld [vmem:[%s5681_s4 + $0x90] sm:$0xff]  ;;  %v613_v22 = vld [vmem:[%s5681_s4 + $0xc0] sm:$0xff]  ;;  %v2746_v55 = vld [vmem:[%s5681_s4 + $0x248] sm:$0xff] }
 0x175   :  { %v4581_v27 = vpack.c.bf16 %v486_v26, %v485_v21  ;;  %v3613_v21 = vpack.c.bf16 %v2728_v20, %v2726_v19  ;;  %v590_v26 = vld [vmem:[%s5681_s4 + $0x8] sm:$0xff]  ;;  %v3635_v13 = vpack.c.bf16 %v607_v10, %v605_v9  ;;  %v611_v17 = vld [vmem:[%s5681_s4 + $0xb0] sm:$0xff]  ;;  %v616_v19 = vld [vmem:[%s5681_s4 + $0xd8] sm:$0xff] }
 0x176   :  { %v3639_v20 = vpack.c.bf16 %v611_v17, %v609_v16  ;;  %v615_v23 = vld [vmem:[%s5681_s4 + $0xd0] sm:$0xff]  ;;  %v2748_v56 = vld [vmem:[%s5681_s4 + $0x258] sm:$0xff]  ;;  %v2757_v10 = vld [vmem:[%s5681_s4 + $0x2a0] sm:$0xff] }
 0x177   :  { %3574 = vmatprep.subr.bf16.mxu1 %v4581_v27  ;;  %3654 = vmatprep.subr.bf16.mxu0 %v4581_v27  ;;  %v2761_v16 = vld [vmem:[%s5681_s4 + $0x2c0] sm:$0xff]  ;;  %v2763_v17 = vld [vmem:[%s5681_s4 + $0x2d0] sm:$0xff] }
 0x178   :  { %3576 = vmatpush3.bf16.msra.mxu1 %v4581_v27  ;;  %3656 = vmatpush3.bf16.msra.mxu0 %v4581_v27 }
 0x179   :  { %3578 = vmatprep.subr.bf16.mxu1 %v4575_v15  ;;  %3730 = vmatprep.subr.bf16.mxu0 %v4575_v15 }
 0x17b   :  { %3108 = vmatmul.mubr.msk.f32.vlgmr.msra.gmra.mrb[0].mxu1 %vm491_vm1, %v488_v29  ;;  %3136 = vmatmul.mubr.msk.f32.vlgmr.msra.gmra.mrb[16].mxu0 %vm491_vm1, %v2730_v31  ;;  %v592_v29 = vld [vmem:[%s5681_s4 + $0x18] sm:$0xff] }
 0x17c   :  { %3580 = vmatpush3.bf16.msra.mxu1 %v4575_v15  ;;  %3732 = vmatpush3.bf16.msra.mxu0 %v4575_v15  ;;  %v3617_v31 = vpack.c.bf16 %v592_v29, %v590_v26  ;;  %v620_v26 = vld [vmem:[%s5681_s4 + $0xf8] sm:$0xff]  ;;  %v3643_v29 = vpack.c.bf16 %v615_v23, %v613_v22  ;;  %v2765_v22 = vld [vmem:[%s5681_s4 + $0x2e0] sm:$0xff]  ;;  %v2767_v23 = vld [vmem:[%s5681_s4 + $0x2f0] sm:$0xff] }
 0x17d   :  { %3582 = vmatprep.subr.bf16.mxu1 %v4581_v27  ;;  %3734 = vmatprep.subr.bf16.mxu0 %v4581_v27 }
 0x17e   :  { %3110 = vmatprep.mubr.msk.f32.mxu1 %vm491_vm1, %v489_v34  ;;  %3138 = vmatprep.mubr.msk.f32.mxu0 %vm491_vm1, %v2731_v35  ;;  %v2810_v34 = vld [vmem:[%s5679_s3 + $0x88] sm:$0xff]  ;;  %v2811_v35 = vld [vmem:[%s5679_s3 + $0x90] sm:$0xff] }
 0x17f   :  { %3111 = vmatmul.mubr.msk.f32.gmra.mrb[2].mxu1 %vm491_vm1, %v490_v36  ;;  %3139 = vmatmul.mubr.msk.f32.gmra.mrb[18].mxu0 %vm491_vm1, %v2732_v37  ;;  %v2812_v36 = vld [vmem:[%s5679_s3 + $0x98] sm:$0xff] }
 0x180   :  { %3584 = vmatpush3.bf16.msra.mxu1 %v4581_v27  ;;  %3736 = vmatpush3.bf16.msra.mxu0 %v4581_v27 }
 0x181   :  { %3121 = vmatprep.mubr.msk.f32.mxu1 %vm491_vm1, %v2689_v41  ;;  %3586 = vmatprep.subr.bf16.mxu1 %v3585_v38 }
 0x182   :  { %3163 = vmatprep.mubr.msk.f32.mxu0 %vm491_vm1, %v2809_v33  ;;  %v617_v33 = vld [vmem:[%s5681_s4 + $0xe0] sm:$0xff] }
 0x183   :  { %3122 = vmatmul.mubr.msk.f32.vlgmr.msra.gmra.mrb[4].mxu1 %vm491_vm1, %v2690_v44  ;;  %3164 = vmatmul.mubr.msk.f32.vlgmr.msra.gmra.mrb[20].mxu0 %vm491_vm1, %v2810_v34  ;;  %v619_v34 = vld [vmem:[%s5681_s4 + $0xf0] sm:$0xff] }
 0x184   :  { %3124 = vmatprep.mubr.msk.f32.mxu1 %vm491_vm1, %v2691_v46  ;;  %3588 = vmatpush1.bf16.msra.mxu1 %v3587_v45  ;;  %v594_v46 = vld [vmem:[%s5681_s4 + $0x28] sm:$0xff]  ;;  %v3647_v42 = vpack.c.bf16 %v619_v34, %v617_v33 }
 0x185   :  { %3590 = vmatprep.subr.bf16.mxu1 %v3589_v47  ;;  %3166 = vmatprep.mubr.msk.f32.mxu0 %vm491_vm1, %v2811_v35  ;;  %v596_v47 = vld [vmem:[%s5681_s4 + $0x38] sm:$0xff]  ;;  %v2738_v35 = vld [vmem:[%s5681_s4 + $0x208] sm:$0xff] }
 0x186   :  { %v3621_v51 = vpack.c.bf16 %v596_v47, %v594_v46  ;;  %v2737_v46 = vld [vmem:[%s5681_s4 + $0x200] sm:$0xff]  ;;  %v2739_v47 = vld [vmem:[%s5681_s4 + $0x210] sm:$0xff]  ;;  %v2770_v33 = vld [vmem:[%s5679_s3 + $0x68] sm:$0xff] }
 0x187   :  { %3125 = vmatmul.mubr.msk.f32.gmra.mrb[6].mxu1 %vm491_vm1, %v2692_v52  ;;  %3167 = vmatmul.mubr.msk.f32.gmra.mrb[22].mxu0 %vm491_vm1, %v2812_v36  ;;  %v593_v52 = vld [vmem:[%s5681_s4 + $0x20] sm:$0xff]  ;;  %v2740_v36 = vld [vmem:[%s5681_s4 + $0x218] sm:$0xff] }
 0x188   :  { %3592 = vmatpush1.bf16.msra.mxu1 %v3591_v53  ;;  %820 = vmatprep.mubr.f32.mxu1 %v4019_v32  ;;  %v595_v53 = vld [vmem:[%s5681_s4 + $0x30] sm:$0xff]  ;;  %v3657_v43 = vpack.c.bf16 %v2740_v36, %v2738_v35 }
 0x189   :  { %3594 = vmatprep.subr.bf16.mxu1 %v3593_v54  ;;  %v3623_v57 = vpack.c.bf16 %v595_v53, %v593_v52  ;;  %v2741_v53 = vld [vmem:[%s5681_s4 + $0x220] sm:$0xff]  ;;  %v2771_v35 = vld [vmem:[%s5679_s3 + $0x70] sm:$0xff]  ;;  %3173 = vmatprep.mubr.msk.f32.mxu0 %vm4021_vm2, %v4019_v32 }
 0x18c   :  { %3596 = vmatpush1.bf16.msra.mxu1 %v3595_v59  ;;  %v597_v59 = vld [vmem:[%s5681_s4 + $0x40] sm:$0xff] }
 0x18d   :  { %3598 = vmatprep.subr.bf16.mxu1 %v3597_v60  ;;  %v599_v60 = vld [vmem:[%s5681_s4 + $0x50] sm:$0xff] }
 0x190   :  { %3600 = vmatpush1.bf16.msra.mxu1 %v3599_v1  ;;  %v3627_v1 = vpack.c.bf16 %v599_v60, %v597_v59  ;;  %v2745_v59 = vld [vmem:[%s5681_s4 + $0x240] sm:$0xff]  ;;  %v2747_v60 = vld [vmem:[%s5681_s4 + $0x250] sm:$0xff] }
 0x191   :  { %3602 = vmatprep.subr.bf16.mxu1 %v3601_v2  ;;  %v3629_v2 = vpack.c.bf16 %v604_v63, %v602_v62  ;;  %v3667_v62 = vpack.c.bf16 %v2747_v60, %v2745_v59  ;;  %v2794_v59 = vld [vmem:[%s5681_s4 + $0x388] sm:$0xff]  ;;  %v2796_v60 = vld [vmem:[%s5681_s4 + $0x398] sm:$0xff] }
 0x194   :  { %3604 = vmatpush1.bf16.msra.mxu1 %v3603_v7  ;;  %v3631_v7 = vpack.c.bf16 %v603_v4, %v601_v3 }
 0x195   :  { %3606 = vmatprep.subr.bf16.mxu1 %v3605_v8  ;;  %v3633_v8 = vpack.c.bf16 %v608_v6, %v606_v5  ;;  %v2753_v5 = vld [vmem:[%s5681_s4 + $0x280] sm:$0xff]  ;;  %v2755_v6 = vld [vmem:[%s5681_s4 + $0x290] sm:$0xff] }
 0x198   :  { %3608 = vmatpush1.bf16.msra.mxu1 %v3607_v11  ;;  %v610_v11 = vld [vmem:[%s5681_s4 + $0xa8] sm:$0xff] }
 0x199   :  { %3610 = vmatprep.subr.bf16.mxu1 %v3609_v14  ;;  %v3637_v14 = vpack.c.bf16 %v612_v12, %v610_v11  ;;  %v2759_v11 = vld [vmem:[%s5681_s4 + $0x2b0] sm:$0xff]  ;;  %v2762_v12 = vld [vmem:[%s5681_s4 + $0x2c8] sm:$0xff] }
 0x19c   :  { %3612 = vmatpush1.bf16.msra.mxu1 %v3611_v18  ;;  %v614_v18 = vld [vmem:[%s5681_s4 + $0xc8] sm:$0xff] }
 0x19d   :  { %3614 = vmatprep.subr.bf16.mxu1 %v3613_v21  ;;  %v3641_v21 = vpack.c.bf16 %v616_v19, %v614_v18  ;;  %v2766_v18 = vld [vmem:[%s5681_s4 + $0x2e8] sm:$0xff]  ;;  %v2768_v19 = vld [vmem:[%s5681_s4 + $0x2f8] sm:$0xff] }
 0x1a0   :  { %3616 = vmatpush1.bf16.msra.mxu1 %v3615_v24  ;;  %v618_v24 = vld [vmem:[%s5681_s4 + $0xe8] sm:$0xff] }
 0x1a1   :  { %3618 = vmatprep.subr.bf16.mxu1 %v3617_v31  ;;  %v3645_v31 = vpack.c.bf16 %v620_v26, %v618_v24  ;;  %v3687_v24 = vpack.c.bf16 %v2767_v23, %v2765_v22  ;;  %v2778_v26 = vld [vmem:[%s5681_s4 + $0x308] sm:$0xff] }
 0x24e   :  { %v4754_v37 = vpop.f32.mrb[0].mxu1  ;;  %v4756_v38 = vpop.f32.mrb[16].mxu0 }
 0x24f   :  { %v4758_v39 = vpop.f32.mrb[1].mxu1  ;;  %v4760_v40 = vpop.f32.mrb[17].mxu0 }
 0x252   :  { %v4762_v41 = vpop.f32.mrb[2].mxu1  ;;  %v4770_v44 = vpop.f32.mrb[18].mxu0 }
 0x253   :  { %v4772_v45 = vpop.f32.mrb[3].mxu1  ;;  %v4780_v48 = vpop.f32.mrb[19].mxu0 }
 0x256   :  { %v3123_v50 = vpop.f32.mrb[4].mxu1 }
 0x257   :  { %v704_v54 = vpop.f32.mrb[5].mxu1 }
 0x258   :  { %821 = vmatmul.mubr.f32.vlgmr.msra.gmra.mrb[8].mxu1 %v704_v54  ;;  %v2743_v54 = vld [vmem:[%s5681_s4 + $0x230] sm:$0xff] }
 0x259   :  { %3620 = vmatpush1.bf16.msra.mxu1 %v3619_v49  ;;  %826 = vmatprep.mubr.f32.mxu1 %v4019_v32  ;;  %v2742_v49 = vld [vmem:[%s5681_s4 + $0x228] sm:$0xff] }
 0x25a   :  { %3622 = vmatprep.subr.bf16.mxu1 %v3621_v51  ;;  %v3126_v61 = vpop.f32.mrb[6].mxu1  ;;  %v3659_v51 = vpack.c.bf16 %v2739_v47, %v2737_v46  ;;  %v2788_v46 = vld [vmem:[%s5681_s4 + $0x358] sm:$0xff] }
 0x25b   :  { %v714_v0 = vpop.f32.mrb[7].mxu1  ;;  %v2772_v47 = vld [vmem:[%s5679_s3 + $0x78] sm:$0xff] }
 0x25c   :  { %827 = vmatmul.mubr.f32.gmra.mrb[10].mxu1 %v3123_v50  ;;  %v2744_v50 = vld [vmem:[%s5681_s4 + $0x238] sm:$0xff] }
 0x25d   :  { %3624 = vmatpush1.bf16.msra.mxu1 %v3623_v57  ;;  %832 = vmatprep.mubr.f32.mxu1 %v4019_v32  ;;  %v3661_v52 = vpack.c.bf16 %v2744_v50, %v2742_v49  ;;  %v3663_v57 = vpack.c.bf16 %v2743_v54, %v2741_v53  ;;  %v2790_v53 = vld [vmem:[%s5681_s4 + $0x368] sm:$0xff]  ;;  %v2792_v54 = vld [vmem:[%s5681_s4 + $0x378] sm:$0xff] }
 0x25e   :  { %3626 = vmatprep.subr.bf16.mxu1 %v3625_v58  ;;  %v3665_v58 = vpack.c.bf16 %v2748_v56, %v2746_v55  ;;  %v3709_v56 = vpack.c.bf16 %v2792_v54, %v2790_v53  ;;  %v2829_v53 = vld [vmem:[%s5681_s4 + $0x460] sm:$0xff]  ;;  %v2831_v54 = vld [vmem:[%s5681_s4 + $0x470] sm:$0xff] }
 0x260   :  { %833 = vmatmul.mubr.f32.gmra.mrb[12].mxu1 %v714_v0  ;;  %v2749_v0 = vld [vmem:[%s5681_s4 + $0x260] sm:$0xff] }
 0x261   :  { %3628 = vmatpush1.bf16.msra.mxu1 %v3627_v1  ;;  %838 = vmatprep.mubr.f32.mxu1 %v4019_v32  ;;  %v2751_v1 = vld [vmem:[%s5681_s4 + $0x270] sm:$0xff] }
 0x262   :  { %3630 = vmatprep.subr.bf16.mxu1 %v3629_v2  ;;  %v2754_v2 = vld [vmem:[%s5681_s4 + $0x288] sm:$0xff]  ;;  %v3671_v3 = vpack.c.bf16 %v2751_v1, %v2749_v0  ;;  %v2800_v1 = vld [vmem:[%s5681_s4 + $0x3b8] sm:$0xff] }
 0x263   :  { %v2798_v0 = vld [vmem:[%s5681_s4 + $0x3a8] sm:$0xff] }
 0x264   :  { %839 = vmatmul.mubr.f32.gmra.mrb[14].mxu1 %v3126_v61  ;;  %v2750_v61 = vld [vmem:[%s5681_s4 + $0x268] sm:$0xff] }
 0x265   :  { %3632 = vmatpush1.bf16.msra.mxu1 %v3631_v7  ;;  %909 = vmatprep.mubr.f32.mxu1 %v4019_v32  ;;  %v2758_v7 = vld [vmem:[%s5681_s4 + $0x2a8] sm:$0xff] }
 0x266   :  { %3634 = vmatprep.subr.bf16.mxu1 %v3633_v8  ;;  %v3675_v8 = vpack.c.bf16 %v2755_v6, %v2753_v5  ;;  %v2802_v5 = vld [vmem:[%s5681_s4 + $0x3c8] sm:$0xff]  ;;  %v2804_v6 = vld [vmem:[%s5681_s4 + $0x3d8] sm:$0xff] }
 0x269   :  { %3636 = vmatpush1.bf16.msra.mxu1 %v3635_v13  ;;  %v3679_v13 = vpack.c.bf16 %v2759_v11, %v2757_v10  ;;  %v2806_v10 = vld [vmem:[%s5681_s4 + $0x3e8] sm:$0xff]  ;;  %v2808_v11 = vld [vmem:[%s5681_s4 + $0x3f8] sm:$0xff] }
 0x26a   :  { %3638 = vmatprep.subr.bf16.mxu1 %v3637_v14 }
 0x26d   :  { %3640 = vmatpush1.bf16.msra.mxu1 %v3639_v20  ;;  %v3683_v20 = vpack.c.bf16 %v2763_v17, %v2761_v16  ;;  %v2818_v17 = vld [vmem:[%s5681_s4 + $0x408] sm:$0xff] }
 0x26e   :  { %3642 = vmatprep.subr.bf16.mxu1 %v3641_v21  ;;  %v3685_v21 = vpack.c.bf16 %v2768_v19, %v2766_v18  ;;  %v2820_v18 = vld [vmem:[%s5681_s4 + $0x418] sm:$0xff] }
 0x26f   :  { %v3737_v19 = vpack.c.bf16 %v2820_v18, %v2818_v17 }
 0x271   :  { %3644 = vmatpush1.bf16.msra.mxu1 %v3643_v29  ;;  %v2780_v29 = vld [vmem:[%s5681_s4 + $0x318] sm:$0xff] }
 0x272   :  { %3646 = vmatprep.subr.bf16.mxu1 %v3645_v31  ;;  %v3697_v31 = vpack.c.bf16 %v2780_v29, %v2778_v26  ;;  %v2819_v26 = vld [vmem:[%s5681_s4 + $0x410] sm:$0xff]  ;;  %v2822_v29 = vld [vmem:[%s5681_s4 + $0x428] sm:$0xff] }
 0x275   :  { %3648 = vmatpush1.bf16.msra.mxu1 %v3647_v42  ;;  %v2781_v42 = vld [vmem:[%s5681_s4 + $0x320] sm:$0xff] }
 0x276   :  { %3658 = vmatprep.subr.bf16.mxu1 %v3657_v43  ;;  %v2786_v43 = vld [vmem:[%s5681_s4 + $0x348] sm:$0xff] }
 0x277   :  { %v3705_v50 = vpack.c.bf16 %v2788_v46, %v2786_v43  ;;  %v2827_v43 = vld [vmem:[%s5681_s4 + $0x450] sm:$0xff] }
 0x278   :  { %910 = vmatmul.mubr.f32.vlgmr.msra.gmra.mrb[8].mxu1 %v4758_v39  ;;  %v2752_v39 = vld [vmem:[%s5681_s4 + $0x278] sm:$0xff] }
 0x279   :  { %3660 = vmatpush1.bf16.msra.mxu1 %v3659_v51  ;;  %915 = vmatprep.mubr.f32.mxu1 %v4019_v32  ;;  %v3669_v63 = vpack.c.bf16 %v2752_v39, %v2750_v61  ;;  %v2785_v51 = vld [vmem:[%s5681_s4 + $0x340] sm:$0xff]  ;;  %v3713_v39 = vpack.c.bf16 %v2796_v60, %v2794_v59  ;;  %v2835_v60 = vld [vmem:[%s5681_s4 + $0x490] sm:$0xff] }
 0x27a   :  { %3662 = vmatprep.subr.bf16.mxu1 %v3661_v52  ;;  %v2787_v52 = vld [vmem:[%s5681_s4 + $0x350] sm:$0xff]  ;;  %v2833_v59 = vld [vmem:[%s5681_s4 + $0x480] sm:$0xff] }
 0x27b   :  { %v3707_v55 = vpack.c.bf16 %v2787_v52, %v2785_v51 }
 0x27c   :  { %916 = vmatmul.mubr.f32.gmra.mrb[10].mxu1 %v4754_v37  ;;  %v2756_v37 = vld [vmem:[%s5681_s4 + $0x298] sm:$0xff] }
 0x27d   :  { %3664 = vmatpush1.bf16.msra.mxu1 %v3663_v57  ;;  %921 = vmatprep.mubr.f32.mxu1 %v4019_v32  ;;  %v3673_v4 = vpack.c.bf16 %v2756_v37, %v2754_v2  ;;  %v2789_v57 = vld [vmem:[%s5681_s4 + $0x360] sm:$0xff]  ;;  %v3717_v37 = vpack.c.bf16 %v2800_v1, %v2798_v0  ;;  %v2839_v1 = vld [vmem:[%s5681_s4 + $0x4b0] sm:$0xff] }
 0x27e   :  { %3666 = vmatprep.subr.bf16.mxu1 %v3665_v58  ;;  %v2791_v58 = vld [vmem:[%s5681_s4 + $0x370] sm:$0xff]  ;;  %v2837_v0 = vld [vmem:[%s5681_s4 + $0x4a0] sm:$0xff] }
 0x27f   :  { %v3711_v61 = vpack.c.bf16 %v2791_v58, %v2789_v57  ;;  %v3751_v57 = vpack.c.bf16 %v2831_v54, %v2829_v53  ;;  %v2871_v53 = vld [vmem:[%s5683_s7 + $0x108] sm:$0xff]  ;;  %v1664_v54 = vld [vmem:[%s5684_s6] sm:$0xff] }
 0x280   :  { %922 = vmatmul.mubr.f32.gmra.mrb[12].mxu1 %v4772_v45  ;;  %v2760_v45 = vld [vmem:[%s5681_s4 + $0x2b8] sm:$0xff] }
 0x281   :  { %3668 = vmatpush1.bf16.msra.mxu1 %v3667_v62  ;;  %927 = vmatprep.mubr.f32.mxu1 %v4019_v32  ;;  %v3677_v9 = vpack.c.bf16 %v2760_v45, %v2758_v7  ;;  %v2793_v62 = vld [vmem:[%s5681_s4 + $0x380] sm:$0xff]  ;;  %v3721_v45 = vpack.c.bf16 %v2804_v6, %v2802_v5  ;;  %v2843_v6 = vld [vmem:[%s5681_s4 + $0x4d0] sm:$0xff] }
 0x282   :  { %3670 = vmatprep.subr.bf16.mxu1 %v3669_v63  ;;  %v2795_v63 = vld [vmem:[%s5681_s4 + $0x390] sm:$0xff]  ;;  %v2841_v5 = vld [vmem:[%s5681_s4 + $0x4c0] sm:$0xff] }
 0x283   :  { %v3715_v2 = vpack.c.bf16 %v2795_v63, %v2793_v62  ;;  %v3755_v62 = vpack.c.bf16 %v2835_v60, %v2833_v59  ;;  %v2872_v59 = vld [vmem:[%s5683_s7 + $0x110] sm:$0xff]  ;;  %v2873_v60 = vld [vmem:[%s5683_s7 + $0x118] sm:$0xff] }
 0x284   :  { %928 = vmatmul.mubr.f32.gmra.mrb[14].mxu1 %v4762_v41  ;;  %v2764_v41 = vld [vmem:[%s5681_s4 + $0x2d8] sm:$0xff] }
 0x285   :  { %3672 = vmatpush1.bf16.msra.mxu1 %v3671_v3  ;;  %1133 = vmatprep.mubr.f32.mxu1 %v4019_v32  ;;  %v3681_v14 = vpack.c.bf16 %v2764_v41, %v2762_v12  ;;  %v2797_v3 = vld [vmem:[%s5681_s4 + $0x3a0] sm:$0xff]  ;;  %v3725_v41 = vpack.c.bf16 %v2808_v11, %v2806_v10  ;;  %v2847_v11 = vld [vmem:[%s5681_s4 + $0x4f0] sm:$0xff] }
 0x286   :  { %3674 = vmatprep.subr.bf16.mxu1 %v3673_v4  ;;  %v2799_v4 = vld [vmem:[%s5681_s4 + $0x3b0] sm:$0xff]  ;;  %v2845_v10 = vld [vmem:[%s5681_s4 + $0x4e0] sm:$0xff] }
 0x287   :  { %v3719_v7 = vpack.c.bf16 %v2799_v4, %v2797_v3  ;;  %v3759_v3 = vpack.c.bf16 %v2839_v1, %v2837_v0  ;;  %v2855_v0 = vld [vmem:[%s5683_s7 + $0x98] sm:$0xff]  ;;  %v2874_v1 = vld [vmem:[%s5683_s7 + $0x120] sm:$0xff] }
 0x289   :  { %3676 = vmatpush1.bf16.msra.mxu1 %v3675_v8  ;;  %v2801_v8 = vld [vmem:[%s5681_s4 + $0x3c0] sm:$0xff] }
 0x28a   :  { %3678 = vmatprep.subr.bf16.mxu1 %v3677_v9  ;;  %v2803_v9 = vld [vmem:[%s5681_s4 + $0x3d0] sm:$0xff] }
 0x28b   :  { %v3723_v12 = vpack.c.bf16 %v2803_v9, %v2801_v8  ;;  %v3763_v8 = vpack.c.bf16 %v2843_v6, %v2841_v5  ;;  %v2857_v5 = vld [vmem:[%s5683_s7 + $0xa8] sm:$0xff]  ;;  %v2876_v6 = vld [vmem:[%s5683_s7 + $0x130] sm:$0xff] }
 0x28d   :  { %3680 = vmatpush1.bf16.msra.mxu1 %v3679_v13  ;;  %v2805_v13 = vld [vmem:[%s5681_s4 + $0x3e0] sm:$0xff] }
 0x28e   :  { %3682 = vmatprep.subr.bf16.mxu1 %v3681_v14  ;;  %v2807_v14 = vld [vmem:[%s5681_s4 + $0x3f0] sm:$0xff] }
 0x28f   :  { %v3727_v16 = vpack.c.bf16 %v2807_v14, %v2805_v13  ;;  %v1630_v14 = vld [vmem:[%s5682_s5] sm:$0x3] }
 0x290   :  { %v1635_v17 = vrot.slane %v1630_v14, %v200_v28  ;;  %v1639_v18 = vrot.slane %v1630_v14, %v204_v30 }
 0x291   :  { %3684 = vmatpush1.bf16.msra.mxu1 %v3683_v20  ;;  %v5098_v20 = vpop.f32.mrb[20].mxu0 }
 0x292   :  { %3686 = vmatprep.subr.bf16.mxu1 %v3685_v21  ;;  %v5100_v21 = vpop.f32.mrb[21].mxu0 }
 0x293   :  { %v5102_v22 = vpop.f32.mrb[22].mxu0 }
 0x294   :  { %v5104_v23 = vpop.f32.mrb[23].mxu0 }
 0x295   :  { %3688 = vmatpush1.bf16.msra.mxu1 %v3687_v24  ;;  %v2817_v24 = vld [vmem:[%s5681_s4 + $0x400] sm:$0xff] }
 0x296   :  { %3690 = vmatprep.subr.bf16.mxu1 %v4575_v15 }
 0x298   :  { %1134 = vmatmul.mubr.f32.vlgmr.msra.gmra.mrb[8].mxu1 %v4760_v40  ;;  %v2777_v40 = vld [vmem:[%s5681_s4 + $0x300] sm:$0xff] }
 0x299   :  { %3692 = vmatpush3.bf16.msra.mxu1 %v4575_v15  ;;  %1139 = vmatprep.mubr.f32.mxu1 %v4019_v32  ;;  %v2769_v15 = vld [vmem:[%s5679_s3 + $0x60] sm:$0xff] }
 0x29a   :  { %3694 = vmatprep.subr.bf16.mxu1 %v4581_v27 }
 0x29c   :  { %1140 = vmatmul.mubr.f32.gmra.mrb[10].mxu1 %v4756_v38  ;;  %v2779_v38 = vld [vmem:[%s5681_s4 + $0x310] sm:$0xff] }
 0x29d   :  { %3696 = vmatpush3.bf16.msra.mxu1 %v4581_v27  ;;  %1145 = vmatprep.mubr.f32.mxu1 %v4019_v32  ;;  %v2782_v27 = vld [vmem:[%s5681_s4 + $0x328] sm:$0xff]  ;;  %v3699_v34 = vpack.c.bf16 %v2779_v38, %v2777_v40 }
 0x29e   :  { %3698 = vmatprep.subr.bf16.mxu1 %v3697_v31  ;;  %v2824_v31 = vld [vmem:[%s5681_s4 + $0x438] sm:$0xff] }
 0x29f   :  { %v3741_v38 = vpack.c.bf16 %v2824_v31, %v2822_v29 }
 0x2a0   :  { %1146 = vmatmul.mubr.f32.gmra.mrb[12].mxu1 %v4780_v48  ;;  %v2784_v48 = vld [vmem:[%s5681_s4 + $0x338] sm:$0xff] }
 0x2a1   :  { %1151 = vmatprep.mubr.f32.mxu1 %v4019_v32  ;;  %v3701_v36 = vpack.c.bf16 %v2784_v48, %v2782_v27  ;;  %v2821_v27 = vld [vmem:[%s5681_s4 + $0x420] sm:$0xff]  ;;  %v2823_v48 = vld [vmem:[%s5681_s4 + $0x430] sm:$0xff] }
 0x2a4   :  { %1152 = vmatmul.mubr.f32.gmra.mrb[14].mxu1 %v4770_v44  ;;  %v2783_v44 = vld [vmem:[%s5681_s4 + $0x330] sm:$0xff] }
 0x2a5   :  { %3149 = vmatprep.mubr.msk.f32.mxu1 %vm491_vm1, %v2769_v15  ;;  %v3703_v49 = vpack.c.bf16 %v2783_v44, %v2781_v42  ;;  %v3739_v15 = vpack.c.bf16 %v2819_v26, %v2817_v24  ;;  %v2825_v44 = vld [vmem:[%s5681_s4 + $0x440] sm:$0xff] }
 0x2a6   :  { %v3747_v51 = vpack.c.bf16 %v2827_v43, %v2825_v44 }
 0x2a8   :  { %3150 = vmatmul.mubr.msk.f32.vlgmr.msra.gmra.mrb[16].mxu1 %vm491_vm1, %v2770_v33 }
 0x2a9   :  { %3152 = vmatprep.mubr.msk.f32.mxu1 %vm491_vm1, %v2771_v35  ;;  %3700 = vmatpush1.bf16.msra.mxu1 %v3699_v34  ;;  %v2826_v34 = vld [vmem:[%s5681_s4 + $0x448] sm:$0xff]  ;;  %v2828_v35 = vld [vmem:[%s5681_s4 + $0x458] sm:$0xff] }
 0x2aa   :  { %3702 = vmatprep.subr.bf16.mxu1 %v3701_v36  ;;  %v3743_v36 = vpack.c.bf16 %v2823_v48, %v2821_v27  ;;  %v3745_v42 = vpack.c.bf16 %v2828_v35, %v2826_v34 }
 0x2ac   :  { %3153 = vmatmul.mubr.msk.f32.gmra.mrb[18].mxu1 %vm491_vm1, %v2772_v47  ;;  %v2830_v47 = vld [vmem:[%s5681_s4 + $0x468] sm:$0xff] }
 0x2ad   :  { %3704 = vmatpush1.bf16.msra.mxu1 %v3703_v49  ;;  %1365 = vmatprep.mubr.f32.mxu1 %v4019_v32  ;;  %v2832_v49 = vld [vmem:[%s5681_s4 + $0x478] sm:$0xff] }
 0x2ae   :  { %3706 = vmatprep.subr.bf16.mxu1 %v3705_v50  ;;  %v3749_v52 = vpack.c.bf16 %v2832_v49, %v2830_v47 }
 0x2b1   :  { %3708 = vmatpush1.bf16.msra.mxu1 %v3707_v55  ;;  %v2834_v55 = vld [vmem:[%s5681_s4 + $0x488] sm:$0xff] }
 0x2b2   :  { %3710 = vmatprep.subr.bf16.mxu1 %v3709_v56  ;;  %v2836_v56 = vld [vmem:[%s5681_s4 + $0x498] sm:$0xff] }
 0x2b3   :  { %v3753_v58 = vpack.c.bf16 %v2836_v56, %v2834_v55  ;;  %v2868_v55 = vld [vmem:[%s5684_s6 + $0x10] sm:$0xff] }
 0x2b5   :  { %3712 = vmatpush1.bf16.msra.mxu1 %v3711_v61  ;;  %v2838_v61 = vld [vmem:[%s5681_s4 + $0x4a8] sm:$0xff] }
 0x2b6   :  { %3714 = vmatprep.subr.bf16.mxu1 %v3713_v39  ;;  %v2840_v39 = vld [vmem:[%s5681_s4 + $0x4b8] sm:$0xff] }
 0x2b7   :  { %v3757_v63 = vpack.c.bf16 %v2840_v39, %v2838_v61  ;;  %v2850_v61 = vld [vmem:[%s5684_s6 + $0x8] sm:$0xff] }
 0x2b9   :  { %3716 = vmatpush1.bf16.msra.mxu1 %v3715_v2  ;;  %v2842_v2 = vld [vmem:[%s5681_s4 + $0x4c8] sm:$0xff] }
 0x2ba   :  { %3718 = vmatprep.subr.bf16.mxu1 %v3717_v37  ;;  %v2844_v37 = vld [vmem:[%s5681_s4 + $0x4d8] sm:$0xff] }
 0x2bb   :  { %v3761_v4 = vpack.c.bf16 %v2844_v37, %v2842_v2  ;;  %v2875_v2 = vld [vmem:[%s5683_s7 + $0x128] sm:$0xff] }
 0x2bd   :  { %3720 = vmatpush1.bf16.msra.mxu1 %v3719_v7  ;;  %v2846_v7 = vld [vmem:[%s5681_s4 + $0x4e8] sm:$0xff] }
 0x2be   :  { %3722 = vmatprep.subr.bf16.mxu1 %v3721_v45  ;;  %v2848_v45 = vld [vmem:[%s5681_s4 + $0x4f8] sm:$0xff] }
 0x2bf   :  { %v3765_v9 = vpack.c.bf16 %v2848_v45, %v2846_v7  ;;  %v2877_v7 = vld [vmem:[%s5683_s7 + $0x138] sm:$0xff] }
 0x2c1   :  { %3724 = vmatpush1.bf16.msra.mxu1 %v3723_v12  ;;  %v3767_v12 = vpack.c.bf16 %v2847_v11, %v2845_v10  ;;  %v2859_v10 = vld [vmem:[%s5683_s7 + $0xb8] sm:$0xff]  ;;  %v2878_v11 = vld [vmem:[%s5683_s7 + $0x140] sm:$0xff] }
 0x2c2   :  { %3726 = vmatprep.subr.bf16.mxu1 %v3725_v41  ;;  %v4020_v41 = vmov 0.0|0.0  }
 0x2c3   :  { %3769 = vmatprep.subr.bf16.mxu0 %v4020_v41 }
 0x2c5   :  { %3728 = vmatpush1.bf16.msra.mxu1 %v3727_v16 }
 0x2c6   :  { %3738 = vmatprep.subr.bf16.mxu1 %v3737_v19 }
 0x37b   :  { %v3151_v40 = vpop.f32.mrb[16].mxu1 }
 0x37c   :  { %v1249_v33 = vpop.f32.mrb[17].mxu1 }
 0x37d   :  { %1366 = vmatmul.mubr.f32.vlgmr.msra.gmra.mrb[8].mxu1 %v1249_v33 }
 0x37e   :  { %3740 = vmatpush1.bf16.msra.mxu1 %v3739_v15  ;;  %1371 = vmatprep.mubr.f32.mxu1 %v4019_v32 }
 0x37f   :  { %3742 = vmatprep.subr.bf16.mxu1 %v3741_v38  ;;  %v3154_v46 = vpop.f32.mrb[18].mxu1 }
 0x380   :  { %v1259_v50 = vpop.f32.mrb[19].mxu1 }
 0x381   :  { %1372 = vmatmul.mubr.f32.gmra.mrb[10].mxu1 %v3151_v40 }
 0x382   :  { %3744 = vmatpush1.bf16.msra.mxu1 %v3743_v36  ;;  %1377 = vmatprep.mubr.f32.mxu1 %v4019_v32 }
 0x383   :  { %3746 = vmatprep.subr.bf16.mxu1 %v3745_v42 }
 0x385   :  { %1378 = vmatmul.mubr.f32.gmra.mrb[12].mxu1 %v1259_v50 }
 0x386   :  { %3748 = vmatpush1.bf16.msra.mxu1 %v3747_v51  ;;  %1383 = vmatprep.mubr.f32.mxu1 %v4019_v32 }
 0x387   :  { %3750 = vmatprep.subr.bf16.mxu1 %v3749_v52  ;;  %v2870_v52 = vld [vmem:[%s5683_s7 + $0x100] sm:$0xff] }
 0x388   :  { %v3827_v56 = vpack.c.bf16 %v2871_v53, %v2870_v52 }
 0x389   :  { %1384 = vmatmul.mubr.f32.gmra.mrb[14].mxu1 %v3154_v46 }
 0x38a   :  { %3752 = vmatpush1.bf16.msra.mxu1 %v3751_v57  ;;  %1597 = vmatprep.mubr.f32.mxu1 %v4019_v32  ;;  %v2852_v57 = vld [vmem:[%s5683_s7 + $0x80] sm:$0xff] }
 0x38b   :  { %3754 = vmatprep.subr.bf16.mxu1 %v3753_v58  ;;  %v2853_v58 = vld [vmem:[%s5683_s7 + $0x88] sm:$0xff] }
 0x38c   :  { %v3776_v39 = vpack.c.bf16 %v2853_v58, %v2852_v57  ;;  %v1745_v58 = vld [vmem:[%s5683_s7 + $0x30] sm:$0xff] }
 0x38e   :  { %3756 = vmatpush1.bf16.msra.mxu1 %v3755_v62  ;;  %v3830_v62 = vpack.c.bf16 %v2873_v60, %v2872_v59  ;;  %v1746_v59 = vld [vmem:[%s5683_s7 + $0x38] sm:$0xff] }
 0x38f   :  { %3758 = vmatprep.subr.bf16.mxu1 %v3757_v63  ;;  %v2854_v63 = vld [vmem:[%s5683_s7 + $0x90] sm:$0xff]  ;;  %v3809_v60 = vpack.c.bf16 %v1746_v59, %v1745_v58  ;;  %v2921_v58 = vld [vmem:[%s5683_s7 + $0x278] sm:$0xff] }
 0x390   :  { %v3779_v37 = vpack.c.bf16 %v2855_v0, %v2854_v63  ;;  %v1749_v63 = vld [vmem:[%s5683_s7 + $0x50] sm:$0xff]  ;;  %v1750_v0 = vld [vmem:[%s5683_s7 + $0x58] sm:$0xff] }
 0x392   :  { %3760 = vmatpush1.bf16.msra.mxu1 %v3759_v3  ;;  %v3833_v3 = vpack.c.bf16 %v2875_v2, %v2874_v1  ;;  %v3815_v1 = vpack.c.bf16 %v1750_v0, %v1749_v63  ;;  %v1751_v2 = vld [vmem:[%s5683_s7 + $0x60] sm:$0xff] }
 0x393   :  { %3762 = vmatprep.subr.bf16.mxu1 %v3761_v4  ;;  %v2856_v4 = vld [vmem:[%s5683_s7 + $0xa0] sm:$0xff] }
 0x394   :  { %v3782_v45 = vpack.c.bf16 %v2857_v5, %v2856_v4  ;;  %v1753_v4 = vld [vmem:[%s5683_s7 + $0x70] sm:$0xff]  ;;  %v1754_v5 = vld [vmem:[%s5683_s7 + $0x78] sm:$0xff] }
 0x396   :  { %3764 = vmatpush1.bf16.msra.mxu1 %v3763_v8  ;;  %v3836_v8 = vpack.c.bf16 %v2877_v7, %v2876_v6  ;;  %v3821_v6 = vpack.c.bf16 %v1754_v5, %v1753_v4  ;;  %v2886_v7 = vld [vmem:[%s5684_s6 + $0x18] sm:$0xff] }
 0x397   :  { %3766 = vmatprep.subr.bf16.mxu1 %v3765_v9  ;;  %v2858_v9 = vld [vmem:[%s5683_s7 + $0xb0] sm:$0xff] }
 0x39a   :  { %3768 = vmatpush1.bf16.msra.mxu1 %v3767_v12  ;;  %v2879_v12 = vld [vmem:[%s5683_s7 + $0x148] sm:$0xff] }
 0x39b   :  { %3823 = vmatprep.subr.bf16.mxu1 %v4020_v41  ;;  %v3839_v14 = vpack.c.bf16 %v2879_v12, %v2878_v11  ;;  %v2890_v11 = vld [vmem:[%s5683_s7 + $0x190] sm:$0xff]  ;;  %v2891_v12 = vld [vmem:[%s5683_s7 + $0x198] sm:$0xff] }
 0x39d   :  { %1598 = vmatmul.mubr.f32.vlgmr.msra.gmra.mrb[8].mxu1 %v5100_v21 }
 0x39e   :  { %1603 = vmatprep.mubr.f32.mxu1 %v4019_v32 }
 0x3a1   :  { %1604 = vmatmul.mubr.f32.gmra.mrb[10].mxu1 %v5098_v20 }
 0x3a2   :  { %1609 = vmatprep.mubr.f32.mxu1 %v4019_v32 }
 0x3a5   :  { %1610 = vmatmul.mubr.f32.gmra.mrb[12].mxu1 %v5104_v23 }
 0x3a6   :  { %1615 = vmatprep.mubr.f32.mxu1 %v4019_v32 }
 0x3a9   :  { %1616 = vmatmul.mubr.f32.gmra.mrb[14].mxu1 %v5102_v22 }
 0x3aa   :  { %3257 = vmatprep.mubr.msk.f32.mxu1 %vm4021_vm2, %v4019_v32 }
 0x470   :  { %v1599_v13 = vpop.f32.mrb[8].mxu1 }
 0x471   :  { %v1601_v16 = vpop.f32.mrb[9].mxu1  ;;  %v1642_v21 = vadd.f32 %v1635_v17, %v1599_v13  ;;  %v3785_v13 = vpack.c.bf16 %v2859_v10, %v2858_v9  ;;  %v2907_v10 = vld [vmem:[%s5683_s7 + $0x208] sm:$0xff] }
 0x472   :  { %v1643_v22 = vadd.f32 %v1639_v18, %v1601_v16  ;;  %v2860_v16 = vld [vmem:[%s5683_s7 + $0xc0] sm:$0xff] }
 0x473   :  { %v1650_v31 = vmax.f32 %v1642_v21, 0.0 }
 0x474   :  { %v1605_v19 = vpop.f32.mrb[10].mxu1  ;;  %v1651_v38 = vmax.f32 %v1643_v22, 0.0  ;;  %v2862_v22 = vld [vmem:[%s5683_s7 + $0xd0] sm:$0xff] }
 0x475   :  { %v1607_v20 = vpop.f32.mrb[11].mxu1  ;;  %v1644_v15 = vadd.f32 %v1635_v17, %v1605_v19  ;;  %v2881_v19 = vld [vmem:[%s5683_s7 + $0x158] sm:$0xff] }
 0x476   :  { %v1645_v27 = vadd.f32 %v1639_v18, %v1607_v20 }
 0x477   :  { %v1652_v36 = vmax.f32 %v1644_v15, 0.0  ;;  %v2864_v15 = vld [vmem:[%s5683_s7 + $0xe0] sm:$0xff] }
 0x478   :  { %v1611_v23 = vpop.f32.mrb[12].mxu1  ;;  %v1653_v44 = vmax.f32 %v1645_v27, 0.0  ;;  %v2885_v27 = vld [vmem:[%s5683_s7 + $0x178] sm:$0xff] }
 0x479   :  { %v1646_v24 = vadd.f32 %v1635_v17, %v1611_v23  ;;  %v1613_v26 = vpop.f32.mrb[13].mxu1  ;;  %v2863_v23 = vld [vmem:[%s5683_s7 + $0xd8] sm:$0xff] }
 0x47a   :  { %v1647_v29 = vadd.f32 %v1639_v18, %v1613_v26  ;;  %v2883_v26 = vld [vmem:[%s5683_s7 + $0x168] sm:$0xff] }
 0x47b   :  { %v1654_v40 = vmax.f32 %v1646_v24, 0.0  ;;  %v2882_v24 = vld [vmem:[%s5683_s7 + $0x160] sm:$0xff] }
 0x47c   :  { %v1655_v48 = vmax.f32 %v1647_v29, 0.0  ;;  %v1617_v33 = vpop.f32.mrb[14].mxu1  ;;  %v3791_v29 = vpack.c.bf16 %v2863_v23, %v2862_v22  ;;  %v2911_v22 = vld [vmem:[%s5683_s7 + $0x228] sm:$0xff] }
 0x47d   :  { %v1658_v34 = vmax.f32 %v1650_v31, %v1654_v40  ;;  %v1648_v28 = vadd.f32 %v1635_v17, %v1617_v33  ;;  %v1619_v35 = vpop.f32.mrb[15].mxu1  ;;  %v2861_v17 = vld [vmem:[%s5683_s7 + $0xc8] sm:$0xff]  ;;  %v3845_v31 = vpack.c.bf16 %v2883_v26, %v2882_v24  ;;  %v2894_v26 = vld [vmem:[%s5683_s7 + $0x1b0] sm:$0xff] }
 0x47e   :  { %v1659_v25 = vmax.f32 %v1651_v38, %v1655_v48  ;;  %v1649_v30 = vadd.f32 %v1639_v18, %v1619_v35  ;;  %v2880_v18 = vld [vmem:[%s5683_s7 + $0x150] sm:$0xff]  ;;  %v3788_v20 = vpack.c.bf16 %v2861_v17, %v2860_v16  ;;  %v2865_v40 = vld [vmem:[%s5683_s7 + $0xe8] sm:$0xff]  ;;  %v2909_v16 = vld [vmem:[%s5683_s7 + $0x218] sm:$0xff]  ;;  %v3857_v17 = vpack.c.bf16 %v2891_v12, %v2890_v11 }
 0x47f   :  { %v1656_v42 = vmax.f32 %v1648_v28, 0.0  ;;  %v3842_v21 = vpack.c.bf16 %v2881_v19, %v2880_v18  ;;  %v2884_v38 = vld [vmem:[%s5683_s7 + $0x170] sm:$0xff]  ;;  %v3794_v48 = vpack.c.bf16 %v2865_v40, %v2864_v15  ;;  %v2867_v28 = vld [vmem:[%s5683_s7 + $0xf8] sm:$0xff]  ;;  %v2892_v19 = vld [vmem:[%s5683_s7 + $0x1a0] sm:$0xff] }
 0x480   :  { %v1662_v43 = vmax.f32 %v1658_v34, %v1659_v25  ;;  %v1657_v46 = vmax.f32 %v1649_v30, 0.0  ;;  %v3848_v33 = vpack.c.bf16 %v2885_v27, %v2884_v38  ;;  %v2866_v34 = vld [vmem:[%s5683_s7 + $0xf0] sm:$0xff]  ;;  %v1739_v25 = vld [vmem:[%s5683_s7] sm:$0xff]  ;;  %v1740_v30 = vld [vmem:[%s5683_s7 + $0x8] sm:$0xff] }
 0x481   :  { %v1660_v47 = vmax.f32 %v1652_v36, %v1656_v42  ;;  %v3797_v35 = vpack.c.bf16 %v2867_v28, %v2866_v34  ;;  %v2913_v15 = vld [vmem:[%s5683_s7 + $0x238] sm:$0xff]  ;;  %v2896_v27 = vld [vmem:[%s5683_s7 + $0x1c0] sm:$0xff]  ;;  %v2915_v34 = vld [vmem:[%s5683_s7 + $0x248] sm:$0xff] }
 0x482   :  { %v1661_v49 = vmax.f32 %v1653_v44, %v1657_v46  ;;  %v3800_v46 = vpack.c.bf16 %v1740_v30, %v1739_v25  ;;  %v2898_v25 = vld [vmem:[%s5683_s7 + $0x1d0] sm:$0xff]  ;;  %v2899_v30 = vld [vmem:[%s5683_s7 + $0x1d8] sm:$0xff]  ;;  %v2490_v11 = vld [vmem:[%s5685_s9 + $0x28] sm:$0xff] }
 0x484   :  { %v1663_v50 = vmax.f32 %v1660_v47, %v1661_v49  ;;  %v2904_v47 = vld [vmem:[%s5684_s6 + $0x20] sm:$0xff]  ;;  %v1741_v49 = vld [vmem:[%s5683_s7 + $0x10] sm:$0xff] }
 0x486   :  { %v5220_v51 = vpack.c.bf16 %v1663_v50, %v1662_v43  ;;  %v1742_v50 = vld [vmem:[%s5683_s7 + $0x18] sm:$0xff] }
 0x488   :  { %3771 = vmatpush3.bf16.msra.mxu0 %v5220_v51  ;;  %3825 = vmatpush3.bf16.msra.mxu1 %v5220_v51 }
 0x489   :  { %3772 = vmatprep.subr.bf16.mxu0 %v4020_v41  ;;  %3826 = vmatprep.subr.bf16.mxu1 %v4020_v41 }
 0x48b   :  { %3174 = vmatmul.mubr.msk.f32.vlgmr.msra.gmra.mrb[24].mxu0 %vm1665_vm3, %v1664_v54  ;;  %3258 = vmatmul.mubr.msk.f32.vlgmr.msra.gmra.mrb[20].mxu1 %vm1665_vm3, %v2868_v55  ;;  %v3803_v54 = vpack.c.bf16 %v1742_v50, %v1741_v49  ;;  %v1743_v55 = vld [vmem:[%s5683_s7 + $0x20] sm:$0xff] }
 0x48c   :  { %3774 = vmatpush3.bf16.msra.mxu0 %v5220_v51  ;;  %3180 = vmatprep.mubr.msk.f32.mxu0 %vm4021_vm2, %v4019_v32  ;;  %v2918_v50 = vld [vmem:[%s5683_s7 + $0x260] sm:$0xff] }
 0x48d   :  { %3828 = vmatpush3.bf16.msra.mxu1 %v3827_v56  ;;  %3775 = vmatprep.subr.bf16.mxu0 %v4020_v41  ;;  %v1744_v56 = vld [vmem:[%s5683_s7 + $0x28] sm:$0xff] }
 0x48e   :  { %3829 = vmatprep.subr.bf16.mxu1 %v4020_v41  ;;  %3292 = vmatprep.mubr.msk.f32.mxu1 %vm4021_vm2, %v4019_v32  ;;  %v3806_v57 = vpack.c.bf16 %v1744_v56, %v1743_v55  ;;  %v2903_v55 = vld [vmem:[%s5683_s7 + $0x1f8] sm:$0xff] }
 0x48f   :  { %3181 = vmatmul.mubr.msk.f32.vlgmr.msra.gmra.mrb[26].mxu0 %vm1665_vm3, %v2850_v61  ;;  %v1747_v61 = vld [vmem:[%s5683_s7 + $0x40] sm:$0xff] }
 0x490   :  { %3777 = vmatpush3.bf16.msra.mxu0 %v3776_v39  ;;  %3215 = vmatprep.mubr.msk.f32.mxu0 %vm4021_vm2, %v4019_v32  ;;  %v1748_v39 = vld [vmem:[%s5683_s7 + $0x48] sm:$0xff] }
 0x491   :  { %3831 = vmatpush3.bf16.msra.mxu1 %v3830_v62  ;;  %3778 = vmatprep.subr.bf16.mxu0 %v4020_v41  ;;  %v3812_v62 = vpack.c.bf16 %v1748_v39, %v1747_v61 }
 0x492   :  { %3832 = vmatprep.subr.bf16.mxu1 %v4020_v41 }
 0x494   :  { %3780 = vmatpush3.bf16.msra.mxu0 %v3779_v37  ;;  %v1752_v37 = vld [vmem:[%s5683_s7 + $0x68] sm:$0xff] }
 0x495   :  { %3834 = vmatpush3.bf16.msra.mxu1 %v3833_v3  ;;  %3781 = vmatprep.subr.bf16.mxu0 %v4020_v41  ;;  %v3818_v3 = vpack.c.bf16 %v1752_v37, %v1751_v2  ;;  %v2486_v2 = vld [vmem:[%s5685_s9 + $0x8] sm:$0xff] }
 0x496   :  { %3835 = vmatprep.subr.bf16.mxu1 %v4020_v41 }
 0x498   :  { %3783 = vmatpush3.bf16.msra.mxu0 %v3782_v45  ;;  %v2888_v45 = vld [vmem:[%s5683_s7 + $0x180] sm:$0xff] }
 0x499   :  { %3837 = vmatpush3.bf16.msra.mxu1 %v3836_v8  ;;  %3784 = vmatprep.subr.bf16.mxu0 %v4020_v41  ;;  %v2906_v8 = vld [vmem:[%s5683_s7 + $0x200] sm:$0xff] }
 0x49a   :  { %3838 = vmatprep.subr.bf16.mxu1 %v4020_v41 }
 0x49c   :  { %3786 = vmatpush3.bf16.msra.mxu0 %v3785_v13  ;;  %v3881_v13 = vpack.c.bf16 %v2907_v10, %v2906_v8  ;;  %v2489_v10 = vld [vmem:[%s5685_s9 + $0x20] sm:$0xff] }
 0x49d   :  { %3840 = vmatpush3.bf16.msra.mxu1 %v3839_v14  ;;  %3787 = vmatprep.subr.bf16.mxu0 %v4020_v41  ;;  %v2908_v14 = vld [vmem:[%s5683_s7 + $0x210] sm:$0xff]  ;;  %v3911_v12 = vpack.c.bf16 %v2490_v11, %v2489_v10 }
 0x49e   :  { %3841 = vmatprep.subr.bf16.mxu1 %v4020_v41  ;;  %v3884_v18 = vpack.c.bf16 %v2909_v16, %v2908_v14  ;;  %v2493_v16 = vld [vmem:[%s5685_s9 + $0x40] sm:$0xff] }
 0x4a0   :  { %3789 = vmatpush3.bf16.msra.mxu0 %v3788_v20  ;;  %v2893_v20 = vld [vmem:[%s5683_s7 + $0x1a8] sm:$0xff] }
 0x4a1   :  { %3843 = vmatpush3.bf16.msra.mxu1 %v3842_v21  ;;  %3790 = vmatprep.subr.bf16.mxu0 %v4020_v41  ;;  %v2910_v21 = vld [vmem:[%s5683_s7 + $0x220] sm:$0xff]  ;;  %v3860_v23 = vpack.c.bf16 %v2893_v20, %v2892_v19  ;;  %v2495_v19 = vld [vmem:[%s5685_s9 + $0x50] sm:$0xff]  ;;  %v2496_v20 = vld [vmem:[%s5685_s9 + $0x58] sm:$0xff] }
 0x4a2   :  { %3844 = vmatprep.subr.bf16.mxu1 %v4020_v41  ;;  %v3887_v24 = vpack.c.bf16 %v2911_v22, %v2910_v21  ;;  %v3920_v21 = vpack.c.bf16 %v2496_v20, %v2495_v19  ;;  %v2497_v22 = vld [vmem:[%s5685_s9 + $0x60] sm:$0xff] }
 0x4a4   :  { %3792 = vmatpush3.bf16.msra.mxu0 %v3791_v29  ;;  %v2895_v29 = vld [vmem:[%s5683_s7 + $0x1b8] sm:$0xff] }
 0x4a5   :  { %3846 = vmatpush3.bf16.msra.mxu1 %v3845_v31  ;;  %3793 = vmatprep.subr.bf16.mxu0 %v4020_v41  ;;  %v2912_v31 = vld [vmem:[%s5683_s7 + $0x230] sm:$0xff]  ;;  %v3863_v40 = vpack.c.bf16 %v2895_v29, %v2894_v26  ;;  %v2500_v29 = vld [vmem:[%s5685_s9 + $0x78] sm:$0xff] }
 0x4a6   :  { %3847 = vmatprep.subr.bf16.mxu1 %v4020_v41  ;;  %v3890_v38 = vpack.c.bf16 %v2913_v15, %v2912_v31  ;;  %v2499_v26 = vld [vmem:[%s5685_s9 + $0x70] sm:$0xff]  ;;  %v2579_v15 = vld [vmem:[%s5686_s11] sm:$0xff] }
 0x4a7   :  { %v3926_v31 = vpack.c.bf16 %v2500_v29, %v2499_v26 }
 0x4a8   :  { %3795 = vmatpush3.bf16.msra.mxu0 %v3794_v48  ;;  %v2897_v48 = vld [vmem:[%s5683_s7 + $0x1c8] sm:$0xff] }
 0x4a9   :  { %3849 = vmatpush3.bf16.msra.mxu1 %v3848_v33  ;;  %3796 = vmatprep.subr.bf16.mxu0 %v4020_v41  ;;  %v2914_v33 = vld [vmem:[%s5683_s7 + $0x240] sm:$0xff]  ;;  %v3866_v28 = vpack.c.bf16 %v2897_v48, %v2896_v27  ;;  %v2582_v48 = vld [vmem:[%s5686_s11 + $0x18] sm:$0xff] }
 0x4aa   :  { %3877 = vmatprep.subr.bf16.mxu1 %v4020_v41 }
 0x4ac   :  { %3798 = vmatpush3.bf16.msra.mxu0 %v3797_v35  ;;  %v3893_v35 = vpack.c.bf16 %v2915_v34, %v2914_v33  ;;  %v2583_v34 = vld [vmem:[%s5686_s11 + $0x20] sm:$0xff] }
 0x4ad   :  { %3799 = vmatprep.subr.bf16.mxu0 %v4020_v41 }
 0x55e   :  { %v2058_v36 = vpop.f32.mrb[20].mxu1  ;;  %v1735_v42 = vpop.f32.mrb[24].mxu0 }
 0x55f   :  { %3293 = vmatmul.mubr.f32.vlgmr.msra.gmra.mrb[22].mxu1 %v2058_v36  ;;  %v3175_v44 = vpop.f32.mrb[25].mxu0  ;;  %v3259_v43 = vpop.f32.mrb[21].mxu1  ;;  %v2916_v36 = vld [vmem:[%s5683_s7 + $0x250] sm:$0xff] }
 0x560   :  { %3879 = vmatpush3.bf16.msra.mxu1 %v5220_v51  ;;  %3341 = vmatprep.mubr.msk.f32.mxu1 %vm4021_vm2, %v4019_v32  ;;  %v3869_v44 = vpack.c.bf16 %v2899_v30, %v2898_v25  ;;  %v2585_v25 = vld [vmem:[%s5686_s11 + $0x30] sm:$0xff]  ;;  %v2586_v30 = vld [vmem:[%s5686_s11 + $0x38] sm:$0xff] }
 0x561   :  { %3880 = vmatprep.subr.bf16.mxu1 %v4020_v41 }
 0x562   :  { %v1826_v52 = vpop.f32.mrb[26].mxu0 }
 0x563   :  { %3216 = vmatmul.mubr.f32.vlgmr.msra.gmra.mrb[28].mxu0 %v1826_v52  ;;  %v3182_v53 = vpop.f32.mrb[27].mxu0  ;;  %3342 = vmatmul.mubr.msk.f32.vlgmr.msra.gmra.mrb[24].mxu1 %vm1665_vm3, %v2904_v47  ;;  %v2901_v47 = vld [vmem:[%s5683_s7 + $0x1e8] sm:$0xff] }
 0x564   :  { %3801 = vmatpush3.bf16.msra.mxu0 %v3800_v46  ;;  %3250 = vmatprep.mubr.msk.f32.mxu0 %vm4021_vm2, %v4019_v32  ;;  %v2900_v46 = vld [vmem:[%s5683_s7 + $0x1e0] sm:$0xff]  ;;  %v2919_v52 = vld [vmem:[%s5683_s7 + $0x268] sm:$0xff] }
 0x565   :  { %3802 = vmatprep.subr.bf16.mxu0 %v4020_v41  ;;  %3376 = vmatprep.mubr.msk.f32.mxu1 %vm4021_vm2, %v4019_v32  ;;  %v3872_v49 = vpack.c.bf16 %v2901_v47, %v2900_v46  ;;  %v3899_v53 = vpack.c.bf16 %v2919_v52, %v2918_v50  ;;  %v2589_v46 = vld [vmem:[%s5686_s11 + $0x50] sm:$0xff]  ;;  %v2590_v47 = vld [vmem:[%s5686_s11 + $0x58] sm:$0xff]  ;;  %v2591_v50 = vld [vmem:[%s5686_s11 + $0x60] sm:$0xff] }
 0x566   :  { %3882 = vmatpush3.bf16.msra.mxu1 %v3881_v13  ;;  %v2491_v13 = vld [vmem:[%s5685_s9 + $0x30] sm:$0xff]  ;;  %v2592_v52 = vld [vmem:[%s5686_s11 + $0x68] sm:$0xff] }
 0x567   :  { %3883 = vmatprep.subr.bf16.mxu1 %v4020_v41 }
 0x568   :  { %3804 = vmatpush3.bf16.msra.mxu0 %v3803_v54  ;;  %v2902_v54 = vld [vmem:[%s5683_s7 + $0x1f0] sm:$0xff] }
 0x569   :  { %3805 = vmatprep.subr.bf16.mxu0 %v4020_v41  ;;  %v3875_v56 = vpack.c.bf16 %v2903_v55, %v2902_v54 }
 0x56a   :  { %3885 = vmatpush3.bf16.msra.mxu1 %v3884_v18 }
 0x56b   :  { %3886 = vmatprep.subr.bf16.mxu1 %v4020_v41 }
 0x56c   :  { %3807 = vmatpush3.bf16.msra.mxu0 %v3806_v57  ;;  %v2920_v57 = vld [vmem:[%s5683_s7 + $0x270] sm:$0xff] }
 0x56d   :  { %3808 = vmatprep.subr.bf16.mxu0 %v4020_v41  ;;  %v3902_v59 = vpack.c.bf16 %v2921_v58, %v2920_v57 }
 0x56e   :  { %3888 = vmatpush3.bf16.msra.mxu1 %v3887_v24 }
 0x56f   :  { %3889 = vmatprep.subr.bf16.mxu1 %v4020_v41 }
 0x570   :  { %3810 = vmatpush3.bf16.msra.mxu0 %v3809_v60 }
 0x571   :  { %3811 = vmatprep.subr.bf16.mxu0 %v4020_v41 }
 0x572   :  { %3891 = vmatpush3.bf16.msra.mxu1 %v3890_v38  ;;  %v2581_v38 = vld [vmem:[%s5686_s11 + $0x10] sm:$0xff] }
 0x573   :  { %3892 = vmatprep.subr.bf16.mxu1 %v4020_v41  ;;  %v3932_v33 = vpack.c.bf16 %v2582_v48, %v2581_v38 }
 0x574   :  { %3813 = vmatpush3.bf16.msra.mxu0 %v3812_v62 }
 0x575   :  { %3814 = vmatprep.subr.bf16.mxu0 %v4020_v41 }
 0x576   :  { %3894 = vmatpush3.bf16.msra.mxu1 %v3893_v35 }
 0x577   :  { %3895 = vmatprep.subr.bf16.mxu1 %v4020_v41 }
 0x578   :  { %3816 = vmatpush3.bf16.msra.mxu0 %v3815_v1  ;;  %v2485_v1 = vld [vmem:[%s5685_s9] sm:$0xff] }
 0x579   :  { %3817 = vmatprep.subr.bf16.mxu0 %v4020_v41  ;;  %v3905_v5 = vpack.c.bf16 %v2486_v2, %v2485_v1 }
 0x57c   :  { %3819 = vmatpush3.bf16.msra.mxu0 %v3818_v3 }
 0x57d   :  { %3820 = vmatprep.subr.bf16.mxu0 %v4020_v41 }
 0x580   :  { %3822 = vmatpush3.bf16.msra.mxu0 %v3821_v6 }
 0x581   :  { %3850 = vmatprep.subr.bf16.mxu0 %v4020_v41 }
 0x583   :  { %3251 = vmatmul.mubr.f32.vlgmr.msra.gmra.mrb[30].mxu0 %v1735_v42  ;;  %v2917_v42 = vld [vmem:[%s5683_s7 + $0x258] sm:$0xff] }
 0x584   :  { %3852 = vmatpush3.bf16.msra.mxu0 %v5220_v51  ;;  %3299 = vmatprep.mubr.msk.f32.mxu0 %vm4021_vm2, %v4019_v32  ;;  %v2889_v51 = vld [vmem:[%s5683_s7 + $0x188] sm:$0xff]  ;;  %v3896_v43 = vpack.c.bf16 %v2917_v42, %v2916_v36  ;;  %v3938_v36 = vpack.c.bf16 %v2586_v30, %v2585_v25  ;;  %v2587_v42 = vld [vmem:[%s5686_s11 + $0x40] sm:$0xff] }
 0x585   :  { %3853 = vmatprep.subr.bf16.mxu0 %v4020_v41  ;;  %v3854_v9 = vpack.c.bf16 %v2889_v51, %v2888_v45  ;;  %v2488_v45 = vld [vmem:[%s5685_s9 + $0x18] sm:$0xff] }
 0x586   :  { %3897 = vmatpush3.bf16.msra.mxu1 %v3896_v43 }
 0x587   :  { %3300 = vmatmul.mubr.msk.f32.vlgmr.msra.gmra.mrb[32].mxu0 %vm1665_vm3, %v2886_v7  ;;  %3898 = vmatprep.subr.bf16.mxu1 %v4020_v41  ;;  %v2487_v7 = vld [vmem:[%s5685_s9 + $0x10] sm:$0xff] }
 0x588   :  { %3334 = vmatprep.mubr.msk.f32.mxu0 %vm4021_vm2, %v4019_v32  ;;  %3855 = vmatpush3.bf16.msra.mxu0 %v3854_v9  ;;  %v3908_v9 = vpack.c.bf16 %v2488_v45, %v2487_v7 }
 0x589   :  { %3856 = vmatprep.subr.bf16.mxu0 %v4020_v41 }
 0x58a   :  { %3900 = vmatpush3.bf16.msra.mxu1 %v3899_v53  ;;  %v3947_v53 = vpack.c.bf16 %v2592_v52, %v2591_v50 }
 0x58b   :  { %3901 = vmatprep.subr.bf16.mxu1 %v4020_v41 }
 0x58c   :  { %3858 = vmatpush3.bf16.msra.mxu0 %v3857_v17  ;;  %v2494_v17 = vld [vmem:[%s5685_s9 + $0x48] sm:$0xff] }
 0x58d   :  { %3859 = vmatprep.subr.bf16.mxu0 %v4020_v41  ;;  %v3917_v18 = vpack.c.bf16 %v2494_v17, %v2493_v16 }
 0x58e   :  { %3903 = vmatpush3.bf16.msra.mxu1 %v3902_v59  ;;  %v2922_v59 = vld [vmem:[%s5687_s8] ss:$0 sm:$0xff] }
 0x58f   :  { %3928 = vmatprep.subr.bf16.mxu1 %v4020_v41 }
 0x590   :  { %3861 = vmatpush3.bf16.msra.mxu0 %v3860_v23  ;;  %v2498_v23 = vld [vmem:[%s5685_s9 + $0x68] sm:$0xff] }
 0x591   :  { %3862 = vmatprep.subr.bf16.mxu0 %v4020_v41  ;;  %v3923_v24 = vpack.c.bf16 %v2498_v23, %v2497_v22 }
 0x594   :  { %3864 = vmatpush3.bf16.msra.mxu0 %v3863_v40  ;;  %v2580_v40 = vld [vmem:[%s5686_s11 + $0x8] sm:$0xff] }
 0x595   :  { %3865 = vmatprep.subr.bf16.mxu0 %v4020_v41  ;;  %v3929_v27 = vpack.c.bf16 %v2580_v40, %v2579_v15 }
 0x598   :  { %3867 = vmatpush3.bf16.msra.mxu0 %v3866_v28  ;;  %v2584_v28 = vld [vmem:[%s5686_s11 + $0x28] sm:$0xff] }
 0x599   :  { %3868 = vmatprep.subr.bf16.mxu0 %v4020_v41  ;;  %v3935_v35 = vpack.c.bf16 %v2584_v28, %v2583_v34 }
 0x59c   :  { %3870 = vmatpush3.bf16.msra.mxu0 %v3869_v44  ;;  %v2588_v44 = vld [vmem:[%s5686_s11 + $0x48] sm:$0xff] }
 0x59d   :  { %3871 = vmatprep.subr.bf16.mxu0 %v4020_v41  ;;  %v3941_v43 = vpack.c.bf16 %v2588_v44, %v2587_v42 }
 0x5a0   :  { %3873 = vmatpush3.bf16.msra.mxu0 %v3872_v49  ;;  %v3944_v49 = vpack.c.bf16 %v2590_v47, %v2589_v46 }
 0x5a1   :  { %3874 = vmatprep.subr.bf16.mxu0 %v4020_v41 }
 0x5a4   :  { %3876 = vmatpush3.bf16.msra.mxu0 %v3875_v56 }
 0x5a5   :  { %3904 = vmatprep.subr.bf16.mxu0 %v4020_v41 }
 0x632   :  { %v2145_v60 = vpop.f32.mrb[22].mxu1 }
 0x633   :  { %v3294_v61 = vpop.f32.mrb[23].mxu1 }
 0x636   :  { %v1913_v39 = vpop.f32.mrb[28].mxu0  ;;  %v2384_v62 = vpop.f32.mrb[24].mxu1 }
 0x637   :  { %v3217_v63 = vpop.f32.mrb[29].mxu0  ;;  %3377 = vmatmul.mubr.f32.vlgmr.msra.gmra.mrb[26].mxu1 %v2384_v62  ;;  %v3343_v0 = vpop.f32.mrb[25].mxu1  ;;  %v2593_v62 = vld [vmem:[%s5686_s11 + $0x70] sm:$0xff] }
 0x638   :  { %3446 = vmatprep.mubr.msk.f32.mxu1 %vm4021_vm2, %v4019_v32  ;;  %3930 = vmatpush3.bf16.msra.mxu1 %v3929_v27  ;;  %v2923_v0 = vld [vmem:[%s5688_s10] ss:$0 sm:$0xff] }
 0x639   :  { %3931 = vmatprep.subr.bf16.mxu1 %v4020_v41 }
 0x63c   :  { %3933 = vmatpush3.bf16.msra.mxu1 %v3932_v33 }
 0x63d   :  { %3934 = vmatprep.subr.bf16.mxu1 %v4020_v41 }
 0x640   :  { %3936 = vmatpush3.bf16.msra.mxu1 %v3935_v35 }
 0x641   :  { %3937 = vmatprep.subr.bf16.mxu1 %v4020_v41 }
 0x644   :  { %3939 = vmatpush3.bf16.msra.mxu1 %v3938_v36 }
 0x645   :  { %3940 = vmatprep.subr.bf16.mxu1 %v4020_v41 }
 0x648   :  { %3942 = vmatpush3.bf16.msra.mxu1 %v3941_v43 }
 0x649   :  { %3943 = vmatprep.subr.bf16.mxu1 %v4020_v41 }
 0x64c   :  { %3945 = vmatpush3.bf16.msra.mxu1 %v3944_v49 }
 0x64d   :  { %3946 = vmatprep.subr.bf16.mxu1 %v4020_v41 }
 0x650   :  { %3948 = vmatpush3.bf16.msra.mxu1 %v3947_v53 }
 0x651   :  { %3949 = vmatprep.subr.bf16.mxu1 %v4020_v41 }
 0x656   :  { %v1983_v37 = vpop.f32.mrb[30].mxu0 }
 0x657   :  { %v1984_v3 = vadd.f32 %v1983_v37, %v1913_v39  ;;  %v3252_v4 = vpop.f32.mrb[31].mxu0 }
 0x658   :  { %v2924_v4 = vld [vmem:[%s5689_s12] ss:$0 sm:$0xff] }
 0x659   :  { %v5556_v6 = vadd.f32 %v2145_v60, %v1984_v3 }
 0x65a   :  { %v2221_v51 = vpop.f32.mrb[32].mxu0 }
 0x65b   :  { %3335 = vmatmul.mubr.f32.vlgmr.msra.gmra.mrb[34].mxu0 %v2221_v51  ;;  %v3301_v8 = vpop.f32.mrb[33].mxu0 }
 0x65c   :  { %3906 = vmatpush3.bf16.msra.mxu0 %v3905_v5  ;;  %3411 = vmatprep.mubr.msk.f32.mxu0 %vm4021_vm2, %v4019_v32  ;;  %v2492_v32 = vld [vmem:[%s5685_s9 + $0x38] sm:$0xff] }
 0x65d   :  { %3907 = vmatprep.subr.bf16.mxu0 %v4020_v41  ;;  %v3914_v14 = vpack.c.bf16 %v2492_v32, %v2491_v13 }
 0x660   :  { %3909 = vmatpush3.bf16.msra.mxu0 %v3908_v9 }
 0x661   :  { %3910 = vmatprep.subr.bf16.mxu0 %v4020_v41 }
 0x664   :  { %3912 = vmatpush3.bf16.msra.mxu0 %v3911_v12 }
 0x665   :  { %3913 = vmatprep.subr.bf16.mxu0 %v4020_v41 }
 0x668   :  { %3915 = vmatpush3.bf16.msra.mxu0 %v3914_v14 }
 0x669   :  { %3916 = vmatprep.subr.bf16.mxu0 %v4020_v41 }
 0x66c   :  { %3918 = vmatpush3.bf16.msra.mxu0 %v3917_v18 }
 0x66d   :  { %3919 = vmatprep.subr.bf16.mxu0 %v4020_v41 }
 0x670   :  { %3921 = vmatpush3.bf16.msra.mxu0 %v3920_v21 }
 0x671   :  { %3922 = vmatprep.subr.bf16.mxu0 %v4020_v41 }
 0x674   :  { %3924 = vmatpush3.bf16.msra.mxu0 %v3923_v24 }
 0x675   :  { %3925 = vmatprep.subr.bf16.mxu0 %v4020_v41  ;;  %v2594_v41 = vld [vmem:[%s5686_s11 + $0x78] sm:$0xff] }
 0x676   :  { %v3950_v63 = vpack.c.bf16 %v2594_v41, %v2593_v62 }
 0x678   :  { %3927 = vmatpush3.bf16.msra.mxu0 %v3926_v31  ;;  %3951 = vmatpush3.bf16.msra.mxu1 %v3950_v63 }
 0x70a   :  { %v2471_v54 = vpop.f32.mrb[26].mxu1 }
 0x70b   :  { %v3378_v55 = vpop.f32.mrb[27].mxu1 }
 0x72e   :  { %v2308_v56 = vpop.f32.mrb[34].mxu0 }
 0x72f   :  { %v2312_v57 = vadd.f32 %v2308_v56, %v5556_v6  ;;  %v3336_v58 = vpop.f32.mrb[35].mxu0 }
 0x731   :  { %v2475_v60 = vadd.f32 %v2471_v54, %v2312_v57 }
 0x733   :  { %v2483_v61 = vadd.f32 %v2922_v59, %v2475_v60 }
 0x735   :  { %v2484_v39 = vmax.f32 %v2483_v61, 0.0 }
 0x737   :  { %3412 = vmatmul.mubr.f32.vlgmr.msra.gmra.mrb[36].mxu0 %v2484_v39 }
 0x80a   :  { %v2574_v1 = vpop.f32.mrb[36].mxu0 }
 0x80b   :  { %v2575_v2 = vadd.f32 %v2923_v0, %v2574_v1  ;;  %v3413_v37 = vpop.f32.mrb[37].mxu0 }
 0x80d   :  { %v2578_v3 = vmax.f32 %v2575_v2, 0.0 }
 0x80f   :  { %3447 = vmatmul.mubr.f32.vlgmr.msra.gmra.mrb[28].mxu1 %v2578_v3 }
 0x8e2   :  { %v2668_v5 = vpop.f32.mrb[28].mxu1 }
 0x8e3   :  { %v2669_v6 = vadd.f32 %v2924_v4, %v2668_v5  ;;  %v3448_v7 = vpop.f32.mrb[29].mxu1 }
 0x8e5   :  { %2672 = vst [vmem:[%s5690_s13] sm:$0xff] %v2669_v6 }

</bundles_post_ra>
